<compile_context>
chip_gen: v7x
topology: tpu7x:2x2x1
jax: 0.10.0
libtpu: 0.0.40
codegen_flags: <defaults>
</compile_context>

<pallas_src>
import functools

import jax
import jax.numpy as jnp
from jax.experimental import pallas as pl
from jax.experimental.pallas import tpu as pltpu


def _round_up(x, m):
    return (x + m - 1) // m * m


def _vmem_budget_bytes():
    """Per-core VMEM budget with headroom; falls back to a v7x-safe default."""
    try:
        cap = int(pltpu.get_tpu_info().vmem_capacity_bytes)
    except Exception:
        cap = 0
    if cap <= 0:
        cap = 64 << 20          # v7x physical VMEM (smallest across generations)
    return (cap * 3) // 4


def _encoder_layer_kernel(x_ref, w_ref, b_ref, wz_ref, bz_ref, h_ref, z_ref,
                          stage_ref, *, taps_by_phase, cin_pad, tile_l):
    """One fused encoder layer tile: 3x3 conv (K-fused) + bias + SiLU + 1x1 zero-conv.

    x_ref   : (1, 1, n_ph, Cin_pad, TILE_L + halo)  bf16  overlapping input window
    w_ref   : (Cout, 9*Cin_pad)                     bf16  packed conv weight
    b_ref   : (Cout, 1)                             f32   conv bias
    wz_ref  : (Cout, Cout)                          bf16  1x1 zero-conv weight
    bz_ref  : (Cout, 1)                             f32   1x1 zero-conv bias
    h_ref   : (1, Cout, TILE_L)                     bf16  silu(conv(x))      -> next layer
    z_ref   : (1, Cout, TILE_L)                     f32   zeroconv(silu(..)) -> deep feature
    stage_ref: (9*Cin_pad, TILE_L)                  bf16  VMEM scratch (tap staging)
    """
    # Stage the 9 shifted tap windows (all static slices) into one K-fused operand.
    for ph, ph_taps in taps_by_phase:
        win = x_ref[0, 0, ph]                          # (Cin_pad, TILE_L + halo)
        for (t, shift) in ph_taps:
            stage_ref[t * cin_pad:(t + 1) * cin_pad, :] = win[:, shift:shift + tile_l]
    # Single MXU matmul with K = 9*Cin_pad, f32 accumulation.
    acc = jnp.dot(w_ref[...], stage_ref[...], preferred_element_type=jnp.float32)
    h = acc + b_ref[...]                               # (Cout, TILE_L) f32
    h = h * jax.nn.sigmoid(h)                          # SiLU (f32, matches reference)
    hb = h.astype(jnp.bfloat16)
    h_ref[0] = hb
    # 1x1 zero-conv on the live bf16 tile (lane-dense full-width store).
    z = jnp.dot(wz_ref[...], hb, preferred_element_type=jnp.float32) + bz_ref[...]
    z_ref[0] = z.astype(z_ref.dtype)


def _conv_silu_zeroconv(x_nchw, w, b, wz, bz, stride, *, tile_l=512,
                        z_dtype=jnp.float32):
    """One FlowControlNetFirstFrameEncoderLayer + zero-conv via a single pallas_call.

    x_nchw: (B, Cin, H, W);  w: (Cout, Cin, 3, 3);  b: (Cout,)
    wz: (Cout, Cout, 1, 1);  bz: (Cout,)
    Returns (h_nchw bf16, z_nchw z_dtype), each (B, Cout, Ho, Wo).
    """
    B, Cin, H, W = x_nchw.shape
    Cout = w.shape[0]
    s = stride
    Ho = (H + 2 - 3) // s + 1
    Wo = (W + 2 - 3) // s + 1

    # ---- host glue (layout only): pad + space-to-depth phase split + flatten ----
    xp = jnp.pad(x_nchw, ((0, 0), (0, 0), (1, 1), (1, 1)))
    Hp, Wp = H + 2, W + 2
    pad_h, pad_w = (-Hp) % s, (-Wp) % s
    if pad_h or pad_w:
        xp = jnp.pad(xp, ((0, 0), (0, 0), (0, pad_h), (0, pad_w)))
        Hp, Wp = Hp + pad_h, Wp + pad_w
    Hrow, Wrow = Hp // s, Wp // s
    n_ph = s * s
    if s == 1:
        phases = xp[:, None]                                      # (B,1,Cin,Hp,Wp)
    else:
        phases = xp.reshape(B, Cin, Hrow, s, Wrow, s)
        phases = jnp.transpose(phases, (0, 3, 5, 1, 2, 4))        # (B,s,s,Cin,Hrow,Wrow)
        phases = phases.reshape(B, n_ph, Cin, Hrow, Wrow)

    lph = Hrow * Wrow                       # valid flattened per-phase length
    lvalid = Ho * Wrow                      # flattened output span (row stride = Wrow)
    tile_l = max(128, _round_up(tile_l, 128))
    tile_l_eff = min(tile_l, _round_up(lvalid, 128))
    n_tiles = -(-lvalid // tile_l_eff)
    lacc = n_tiles * tile_l_eff

    # Tap (kh,kw) reads phase (kh%s, kw%s) at flat offset (kh//s)*Wrow + (kw//s).
    max_shift = (2 // s) * Wrow + (2 // s)
    halo = _round_up(max_shift, 128)
    win = tile_l_eff + halo
    lin = _round_up(max(lph, lacc + halo), 128)

    cin_pad = _round_up(Cin, 16)            # bf16 native sublane tile
    K = 9 * cin_pad

    xflat = phases.reshape(B, n_ph, Cin, lph).astype(jnp.bfloat16)
    xflat = jnp.pad(xflat, ((0, 0), (0, 0), (0, cin_pad - Cin), (0, lin - lph)))
    # Overlapping L tiles (tile + halo) so every in-kernel slice is static.
    xtiles = jnp.stack(
        [xflat[:, :, :, t * tile_l_eff: t * tile_l_eff + win] for t in range(n_tiles)],
        axis=1)                              # (B, n_tiles, n_ph, Cin_pad, win)

    taps = {}
    for kh in range(3):
        for kw in range(3):
            ph = (kh % s) * s + (kw % s)
            shift = (kh // s) * Wrow + (kw // s)
            taps.setdefault(ph, []).append((kh * 3 + kw, shift))
    taps_by_phase = tuple((ph, tuple(tp)) for ph, tp in sorted(taps.items()))

    # Packed weights: w_packed[o, t*Cin_pad + c] = w[o, c, kh, kw], t = kh*3 + kw.
    wt = jnp.transpose(w, (2, 3, 0, 1)).reshape(9, Cout, Cin)
    wt = jnp.pad(wt, ((0, 0), (0, 0), (0, cin_pad - Cin)))
    w_packed = jnp.transpose(wt, (1, 0, 2)).reshape(Cout, K).astype(jnp.bfloat16)
    wz2d = wz[:, :, 0, 0].astype(jnp.bfloat16)
    b2d = b.reshape(Cout, 1).astype(jnp.float32)
    bz2d = bz.reshape(Cout, 1).astype(jnp.float32)

    kern = functools.partial(_encoder_layer_kernel, taps_by_phase=taps_by_phase,
                             cin_pad=cin_pad, tile_l=tile_l_eff)

    z_bytes = jnp.dtype(z_dtype).itemsize
    flops = 2 * B * lacc * Cout * (K + Cout)
    bytes_accessed = int(xtiles.size * 2 + w_packed.size * 2 + wz2d.size * 2
                         + (b2d.size + bz2d.size) * 4
                         + B * Cout * lacc * (2 + z_bytes))

    # VMEM budget: double-buffered x / weight / output blocks + staging scratch.
    block_bytes = 2 * (n_ph * cin_pad * win * 2)
    block_bytes += 2 * (Cout * K * 2 + Cout * Cout * 2 + 2 * Cout * 128 * 4)
    block_bytes += 2 * (Cout * tile_l_eff * (2 + z_bytes))
    block_bytes += K * tile_l_eff * 2
    vmem_limit = int(min(max(2 * block_bytes, 16 << 20), _vmem_budget_bytes()))

    h_flat, z_flat = pl.pallas_call(
        kern,
        out_shape=(
            jax.ShapeDtypeStruct((B, Cout, lacc), jnp.bfloat16),
            jax.ShapeDtypeStruct((B, Cout, lacc), z_dtype),
        ),
        grid_spec=pltpu.PrefetchScalarGridSpec(
            num_scalar_prefetch=0,
            grid=(B, n_tiles),
            in_specs=[
                pl.BlockSpec((1, 1, n_ph, cin_pad, win), lambda i, j: (i, j, 0, 0, 0)),
                pl.BlockSpec((Cout, K), lambda i, j: (0, 0)),
                pl.BlockSpec((Cout, 1), lambda i, j: (0, 0)),
                pl.BlockSpec((Cout, Cout), lambda i, j: (0, 0)),
                pl.BlockSpec((Cout, 1), lambda i, j: (0, 0)),
            ],
            out_specs=[
                pl.BlockSpec((1, Cout, tile_l_eff), lambda i, j: (i, 0, j)),
                pl.BlockSpec((1, Cout, tile_l_eff), lambda i, j: (i, 0, j)),
            ],
            scratch_shapes=[pltpu.VMEM((K, tile_l_eff), jnp.bfloat16)],
        ),
        compiler_params=pltpu.CompilerParams(
            dimension_semantics=("parallel", "parallel"),
            vmem_limit_bytes=vmem_limit),
        cost_estimate=pl.CostEstimate(
            flops=flops,
            transcendentals=B * Cout * lacc,
            bytes_accessed=bytes_accessed),
    )(xtiles, w_packed, b2d, wz2d, bz2d)

    # ---- glue: un-flatten the lane-dense outputs back to NCHW spatial ----
    def unflatten(y):
        y = y[:, :, :Ho * Wrow].reshape(B, Cout, Ho, Wrow)
        return y[:, :, :, :Wo]          # drop row wrap-around garbage columns

    return unflatten(h_flat), unflatten(z_flat)


def init_cond_feature_encoder_params(key, c_in, channels, zero_init_zeroconv=True):
    """Synthetic parameters mirroring CondFeatureEncoder.__init__ (NCHW/OIHW layouts)."""
    params = []
    cin = c_in
    for ch in channels:
        key, k_w, k_b, k_zw, k_zb = jax.random.split(key, 5)
        w = 0.05 * jax.random.normal(k_w, (ch, cin, 3, 3), dtype=jnp.float32)
        b = 0.05 * jax.random.normal(k_b, (ch,), dtype=jnp.float32)
        if zero_init_zeroconv:
            # zero_module(nn.Conv2d(ch, ch, 1)) in the original module.
            wz = jnp.zeros((ch, ch, 1, 1), dtype=jnp.float32)
            bz = jnp.zeros((ch,), dtype=jnp.float32)
        else:
            wz = 0.1 * jax.random.normal(k_zw, (ch, ch, 1, 1), dtype=jnp.float32)
            bz = 0.1 * jax.random.normal(k_zb, (ch,), dtype=jnp.float32)
        params.append((w, b, wz, bz))
        cin = ch
    return params


def cond_feature_encoder_forward(first_frame_nchw, params, downsamples, tile_l=512):
    """Matches CondFeatureEncoder.forward: returns the list of deep features (NCHW)."""
    x = first_frame_nchw
    deep_features = []
    for (w, b, wz, bz), ds in zip(params, downsamples):
        stride = 2 if ds else 1
        h, z = _conv_silu_zeroconv(x, w, b, wz, bz, stride, tile_l=tile_l)
        x = h                       # bf16 activation feeds the next layer
        deep_features.append(z)     # f32 deep feature
    return deep_features


def _reference_forward(first_frame_nchw, params, downsamples):
    """Pure-JAX reference (lax.conv) with matching bf16-operand / f32-accum precision."""
    x = first_frame_nchw
    outs = []
    for (w, b, wz, bz), ds in zip(params, downsamples):
        stride = 2 if ds else 1
        y = jax.lax.conv_general_dilated(
            x.astype(jnp.bfloat16), w.astype(jnp.bfloat16),
            window_strides=(stride, stride), padding=((1, 1), (1, 1)),
            dimension_numbers=("NCHW", "OIHW", "NCHW"),
            preferred_element_type=jnp.float32)
        y = y + b[None, :, None, None]
        h = y * jax.nn.sigmoid(y)
        hb = h.astype(jnp.bfloat16)
        z = jax.lax.conv_general_dilated(
            hb, wz.astype(jnp.bfloat16),
            window_strides=(1, 1), padding=((0, 0), (0, 0)),
            dimension_numbers=("NCHW", "OIHW", "NCHW"),
            preferred_element_type=jnp.float32)
        z = z + bz[None, :, None, None]
        outs.append(z)
        x = hb
    return outs


if __name__ == "__main__":
    # Small shapes consistent with the module: NCHW input, 3 encoder layers.
    B, C_IN, H, W = 2, 4, 16, 16
    CHANNELS = [8, 16, 32]

    key = jax.random.PRNGKey(0)
    key, k_x = jax.random.split(key)
    first_frame = jax.random.normal(k_x, (B, C_IN, H, W), dtype=jnp.float32)

    # Non-zero zero-conv weights so the conv+SiLU path is actually validated
    # (the real module zero-inits them, which would make every output trivially 0).
    params = init_cond_feature_encoder_params(
        key, C_IN, CHANNELS, zero_init_zeroconv=False)

    # Exercise stride-2, stride-1, single-L-tile and multi-L-tile grid paths.
    for downsamples, tile_l in (([True, True, True], 512),
                                ([False, True, True], 128)):
        fwd = jax.jit(functools.partial(
            cond_feature_encoder_forward, downsamples=downsamples, tile_l=tile_l))
        deep_features = fwd(first_frame, params)
        deep_features = [jax.block_until_ready(f) for f in deep_features]

        ref_features = _reference_forward(first_frame, params, downsamples)
        for got, want in zip(deep_features, ref_features):
            assert got.shape == want.shape, (got.shape, want.shape)
            err = jnp.max(jnp.abs(got.astype(jnp.float32) - want.astype(jnp.float32)))
            assert float(err) < 1e-2, float(err)

    print("KERNEL_OK")
</pallas_src>

<mosaic_0001>
module attributes {stable_mosaic.version = 11 : i64} {
  func.func @_encoder_layer_kernel(%arg0: i32, %arg1: i32, %arg2: memref<1x1x4x16x256xbf16, #tpu.memory_space<vmem>>, %arg3: memref<8x144xbf16, #tpu.memory_space<vmem>>, %arg4: memref<8x1xf32, #tpu.memory_space<vmem>>, %arg5: memref<8x8xbf16, #tpu.memory_space<vmem>>, %arg6: memref<8x1xf32, #tpu.memory_space<vmem>>, %arg7: memref<1x8x128xbf16, #tpu.memory_space<vmem>>, %arg8: memref<1x8x128xf32, #tpu.memory_space<vmem>>, %arg9: memref<144x128xbf16, #tpu.memory_space<vmem>>) attributes {dimension_semantics = [#tpu.dimension_semantics<parallel>, #tpu.dimension_semantics<parallel>], iteration_bounds = array<i64: 2, 1>, scalar_prefetch = 0 : i64, scratch_operands = 1 : i64, tpu.core_type = #tpu.core_type<tc>, window_params = [{transform_indices = @transform_0, window_bounds = array<i64: 1, 1, 4, 16, 256>}, {pipeline_mode = #tpu.pipeline_mode<synchronous>, transform_indices = @transform_1, window_bounds = array<i64: 8, 144>}, {pipeline_mode = #tpu.pipeline_mode<synchronous>, transform_indices = @transform_2, window_bounds = array<i64: 8, 1>}, {pipeline_mode = #tpu.pipeline_mode<synchronous>, transform_indices = @transform_3, window_bounds = array<i64: 8, 8>}, {pipeline_mode = #tpu.pipeline_mode<synchronous>, transform_indices = @transform_4, window_bounds = array<i64: 8, 1>}, {transform_indices = @transform_5, window_bounds = array<i64: 1, 8, 128>}, {transform_indices = @transform_6, window_bounds = array<i64: 1, 8, 128>}]} {
    %c0 = arith.constant 0 : index
    %c0_0 = arith.constant 0 : index
    %c0_1 = arith.constant 0 : index
    %c0_2 = arith.constant 0 : index
    %c0_3 = arith.constant 0 : index
    %0 = vector.load %arg2[%c0, %c0_0, %c0_1, %c0_2, %c0_3] : memref<1x1x4x16x256xbf16, #tpu.memory_space<vmem>>, vector<1x1x1x16x256xbf16>
    %1 = vector.shape_cast %0 : vector<1x1x1x16x256xbf16> to vector<16x256xbf16>
    %2 = vector.extract_strided_slice %1 {offsets = [0, 0], sizes = [16, 128], strides = [1, 1]} : vector<16x256xbf16> to vector<16x128xbf16>
    %c0_4 = arith.constant 0 : index
    %c0_5 = arith.constant 0 : index
    %3 = vector.load %arg9[%c0_4, %c0_5] : memref<144x128xbf16, #tpu.memory_space<vmem>>, vector<16x128xbf16>
    tpu.vector_store %arg9[%c0_4, %c0_5], %2 {strides = array<i32>} : memref<144x128xbf16, #tpu.memory_space<vmem>>, vector<16x128xbf16>,
    %4 = vector.extract_strided_slice %1 {offsets = [0, 1], sizes = [16, 128], strides = [1, 1]} : vector<16x256xbf16> to vector<16x128xbf16>
    %c32 = arith.constant 32 : index
    %c0_6 = arith.constant 0 : index
    %5 = vector.load %arg9[%c32, %c0_6] : memref<144x128xbf16, #tpu.memory_space<vmem>>, vector<16x128xbf16>
    tpu.vector_store %arg9[%c32, %c0_6], %4 {strides = array<i32>} : memref<144x128xbf16, #tpu.memory_space<vmem>>, vector<16x128xbf16>,
    %6 = vector.extract_strided_slice %1 {offsets = [0, 9], sizes = [16, 128], strides = [1, 1]} : vector<16x256xbf16> to vector<16x128xbf16>
    %c96 = arith.constant 96 : index
    %c0_7 = arith.constant 0 : index
    %7 = vector.load %arg9[%c96, %c0_7] : memref<144x128xbf16, #tpu.memory_space<vmem>>, vector<16x128xbf16>
    tpu.vector_store %arg9[%c96, %c0_7], %6 {strides = array<i32>} : memref<144x128xbf16, #tpu.memory_space<vmem>>, vector<16x128xbf16>,
    %8 = vector.extract_strided_slice %1 {offsets = [0, 10], sizes = [16, 128], strides = [1, 1]} : vector<16x256xbf16> to vector<16x128xbf16>
    %c128 = arith.constant 128 : index
    %c0_8 = arith.constant 0 : index
    %9 = vector.load %arg9[%c128, %c0_8] : memref<144x128xbf16, #tpu.memory_space<vmem>>, vector<16x128xbf16>
    tpu.vector_store %arg9[%c128, %c0_8], %8 {strides = array<i32>} : memref<144x128xbf16, #tpu.memory_space<vmem>>, vector<16x128xbf16>,
    %c0_9 = arith.constant 0 : index
    %c0_10 = arith.constant 0 : index
    %c1 = arith.constant 1 : index
    %c0_11 = arith.constant 0 : index
    %c0_12 = arith.constant 0 : index
    %10 = vector.load %arg2[%c0_9, %c0_10, %c1, %c0_11, %c0_12] : memref<1x1x4x16x256xbf16, #tpu.memory_space<vmem>>, vector<1x1x1x16x256xbf16>
    %11 = vector.shape_cast %10 : vector<1x1x1x16x256xbf16> to vector<16x256xbf16>
    %12 = vector.extract_strided_slice %11 {offsets = [0, 0], sizes = [16, 128], strides = [1, 1]} : vector<16x256xbf16> to vector<16x128xbf16>
    %c16 = arith.constant 16 : index
    %c0_13 = arith.constant 0 : index
    %13 = vector.load %arg9[%c16, %c0_13] : memref<144x128xbf16, #tpu.memory_space<vmem>>, vector<16x128xbf16>
    tpu.vector_store %arg9[%c16, %c0_13], %12 {strides = array<i32>} : memref<144x128xbf16, #tpu.memory_space<vmem>>, vector<16x128xbf16>,
    %14 = vector.extract_strided_slice %11 {offsets = [0, 9], sizes = [16, 128], strides = [1, 1]} : vector<16x256xbf16> to vector<16x128xbf16>
    %c112 = arith.constant 112 : index
    %c0_14 = arith.constant 0 : index
    %15 = vector.load %arg9[%c112, %c0_14] : memref<144x128xbf16, #tpu.memory_space<vmem>>, vector<16x128xbf16>
    tpu.vector_store %arg9[%c112, %c0_14], %14 {strides = array<i32>} : memref<144x128xbf16, #tpu.memory_space<vmem>>, vector<16x128xbf16>,
    %c0_15 = arith.constant 0 : index
    %c0_16 = arith.constant 0 : index
    %c2 = arith.constant 2 : index
    %c0_17 = arith.constant 0 : index
    %c0_18 = arith.constant 0 : index
    %16 = vector.load %arg2[%c0_15, %c0_16, %c2, %c0_17, %c0_18] : memref<1x1x4x16x256xbf16, #tpu.memory_space<vmem>>, vector<1x1x1x16x256xbf16>
    %17 = vector.shape_cast %16 : vector<1x1x1x16x256xbf16> to vector<16x256xbf16>
    %18 = vector.extract_strided_slice %17 {offsets = [0, 0], sizes = [16, 128], strides = [1, 1]} : vector<16x256xbf16> to vector<16x128xbf16>
    %c48 = arith.constant 48 : index
    %c0_19 = arith.constant 0 : index
    %19 = vector.load %arg9[%c48, %c0_19] : memref<144x128xbf16, #tpu.memory_space<vmem>>, vector<16x128xbf16>
    tpu.vector_store %arg9[%c48, %c0_19], %18 {strides = array<i32>} : memref<144x128xbf16, #tpu.memory_space<vmem>>, vector<16x128xbf16>,
    %20 = vector.extract_strided_slice %17 {offsets = [0, 1], sizes = [16, 128], strides = [1, 1]} : vector<16x256xbf16> to vector<16x128xbf16>
    %c80 = arith.constant 80 : index
    %c0_20 = arith.constant 0 : index
    %21 = vector.load %arg9[%c80, %c0_20] : memref<144x128xbf16, #tpu.memory_space<vmem>>, vector<16x128xbf16>
    tpu.vector_store %arg9[%c80, %c0_20], %20 {strides = array<i32>} : memref<144x128xbf16, #tpu.memory_space<vmem>>, vector<16x128xbf16>,
    %c0_21 = arith.constant 0 : index
    %c0_22 = arith.constant 0 : index
    %c3 = arith.constant 3 : index
    %c0_23 = arith.constant 0 : index
    %c0_24 = arith.constant 0 : index
    %22 = vector.load %arg2[%c0_21, %c0_22, %c3, %c0_23, %c0_24] : memref<1x1x4x16x256xbf16, #tpu.memory_space<vmem>>, vector<1x1x1x16x256xbf16>
    %23 = vector.shape_cast %22 : vector<1x1x1x16x256xbf16> to vector<16x256xbf16>
    %24 = vector.extract_strided_slice %23 {offsets = [0, 0], sizes = [16, 128], strides = [1, 1]} : vector<16x256xbf16> to vector<16x128xbf16>
    %c64 = arith.constant 64 : index
    %c0_25 = arith.constant 0 : index
    %25 = vector.load %arg9[%c64, %c0_25] : memref<144x128xbf16, #tpu.memory_space<vmem>>, vector<16x128xbf16>
    tpu.vector_store %arg9[%c64, %c0_25], %24 {strides = array<i32>} : memref<144x128xbf16, #tpu.memory_space<vmem>>, vector<16x128xbf16>,
    %c0_26 = arith.constant 0 : index
    %c0_27 = arith.constant 0 : index
    %26 = vector.load %arg3[%c0_26, %c0_27] : memref<8x144xbf16, #tpu.memory_space<vmem>>, vector<8x144xbf16>
    %c0_28 = arith.constant 0 : index
    %c0_29 = arith.constant 0 : index
    %27 = vector.load %arg9[%c0_28, %c0_29] : memref<144x128xbf16, #tpu.memory_space<vmem>>, vector<144x128xbf16>
    %cst = arith.constant dense<0.000000e+00> : vector<8x128xf32>
    %28 = tpu.matmul %26, %27, %cst {dimension_numbers = #tpu.dot_dimension_numbers<[1], [0], [0], [1], [0, 0, 1, 1], [], []>} : vector<8x144xbf16>, vector<144x128xbf16>, vector<8x128xf32> -> vector<8x128xf32>
    %c0_30 = arith.constant 0 : index
    %c0_31 = arith.constant 0 : index
    %29 = vector.load %arg4[%c0_30, %c0_31] : memref<8x1xf32, #tpu.memory_space<vmem>>, vector<8x1xf32>
    %30 = vector.broadcast %29 : vector<8x1xf32> to vector<8x128xf32>
    %31 = arith.addf %28, %30 : vector<8x128xf32>
    %32 = arith.negf %31 : vector<8x128xf32>
    %33 = math.exp %32 : vector<8x128xf32>
    %cst_32 = arith.constant 1.000000e+00 : f32
    %34 = vector.broadcast %cst_32 : f32 to vector<8x128xf32>
    %35 = arith.addf %34, %33 : vector<8x128xf32>
    %36 = arith.divf %34, %35 : vector<8x128xf32>
    %37 = arith.mulf %31, %36 : vector<8x128xf32>
    %38 = arith.truncf %37 : vector<8x128xf32> to vector<8x128xbf16>
    %c0_33 = arith.constant 0 : index
    %c0_34 = arith.constant 0 : index
    %c0_35 = arith.constant 0 : index
    %39 = vector.load %arg7[%c0_33, %c0_34, %c0_35] : memref<1x8x128xbf16, #tpu.memory_space<vmem>>, vector<1x8x128xbf16>
    %40 = vector.shape_cast %39 : vector<1x8x128xbf16> to vector<8x128xbf16>
    %41 = vector.shape_cast %38 : vector<8x128xbf16> to vector<1x8x128xbf16>
    tpu.vector_store %arg7[%c0_33, %c0_34, %c0_35], %41 {strides = array<i32>} : memref<1x8x128xbf16, #tpu.memory_space<vmem>>, vector<1x8x128xbf16>,
    %c0_36 = arith.constant 0 : index
    %c0_37 = arith.constant 0 : index
    %42 = vector.load %arg5[%c0_36, %c0_37] : memref<8x8xbf16, #tpu.memory_space<vmem>>, vector<8x8xbf16>
    %cst_38 = arith.constant dense<0.000000e+00> : vector<8x128xf32>
    %43 = tpu.matmul %42, %38, %cst_38 {dimension_numbers = #tpu.dot_dimension_numbers<[1], [0], [0], [1], [0, 0, 1, 1], [], []>} : vector<8x8xbf16>, vector<8x128xbf16>, vector<8x128xf32> -> vector<8x128xf32>
    %c0_39 = arith.constant 0 : index
    %c0_40 = arith.constant 0 : index
    %44 = vector.load %arg6[%c0_39, %c0_40] : memref<8x1xf32, #tpu.memory_space<vmem>>, vector<8x1xf32>
    %45 = vector.broadcast %44 : vector<8x1xf32> to vector<8x128xf32>
    %46 = arith.addf %43, %45 : vector<8x128xf32>
    %c0_41 = arith.constant 0 : index
    %c0_42 = arith.constant 0 : index
    %c0_43 = arith.constant 0 : index
    %47 = vector.load %arg8[%c0_41, %c0_42, %c0_43] : memref<1x8x128xf32, #tpu.memory_space<vmem>>, vector<1x8x128xf32>
    %48 = vector.shape_cast %47 : vector<1x8x128xf32> to vector<8x128xf32>
    %49 = vector.shape_cast %46 : vector<8x128xf32> to vector<1x8x128xf32>
    tpu.vector_store %arg8[%c0_41, %c0_42, %c0_43], %49 {strides = array<i32>} : memref<1x8x128xf32, #tpu.memory_space<vmem>>, vector<1x8x128xf32>,
    return
  }
  func.func @transform_0(%arg0: i32, %arg1: i32) -> (i32, i32, i32, i32, i32) {
    %c0_i32 = arith.constant 0 : i32
    %c0_i32_0 = arith.constant 0 : i32
    %c0_i32_1 = arith.constant 0 : i32
    %c0_i32_2 = arith.constant 0 : i32
    return %arg0, %arg1, %c0_i32, %c0_i32_0, %c0_i32_1 : i32, i32, i32, i32, i32
  }
  func.func @transform_1(%arg0: i32, %arg1: i32) -> (i32, i32) {
    %c0_i32 = arith.constant 0 : i32
    %c0_i32_0 = arith.constant 0 : i32
    %c0_i32_1 = arith.constant 0 : i32
    return %c0_i32, %c0_i32_0 : i32, i32
  }
  func.func @transform_2(%arg0: i32, %arg1: i32) -> (i32, i32) {
    %c0_i32 = arith.constant 0 : i32
    %c0_i32_0 = arith.constant 0 : i32
    %c0_i32_1 = arith.constant 0 : i32
    return %c0_i32, %c0_i32_0 : i32, i32
  }
  func.func @transform_3(%arg0: i32, %arg1: i32) -> (i32, i32) {
    %c0_i32 = arith.constant 0 : i32
    %c0_i32_0 = arith.constant 0 : i32
    %c0_i32_1 = arith.constant 0 : i32
    return %c0_i32, %c0_i32_0 : i32, i32
  }
  func.func @transform_4(%arg0: i32, %arg1: i32) -> (i32, i32) {
    %c0_i32 = arith.constant 0 : i32
    %c0_i32_0 = arith.constant 0 : i32
    %c0_i32_1 = arith.constant 0 : i32
    return %c0_i32, %c0_i32_0 : i32, i32
  }
  func.func @transform_5(%arg0: i32, %arg1: i32) -> (i32, i32, i32) {
    %c0_i32 = arith.constant 0 : i32
    %c0_i32_0 = arith.constant 0 : i32
    return %arg0, %c0_i32, %arg1 : i32, i32, i32
  }
  func.func @transform_6(%arg0: i32, %arg1: i32) -> (i32, i32, i32) {
    %c0_i32 = arith.constant 0 : i32
    %c0_i32_0 = arith.constant 0 : i32
    return %arg0, %c0_i32, %arg1 : i32, i32, i32
  }
}

module attributes {stable_mosaic.version = 11 : i64} {
  func.func @_encoder_layer_kernel(%arg0: i32, %arg1: i32, %arg2: memref<1x1x4x16x256xbf16, #tpu.memory_space<vmem>>, %arg3: memref<16x144xbf16, #tpu.memory_space<vmem>>, %arg4: memref<16x1xf32, #tpu.memory_space<vmem>>, %arg5: memref<16x16xbf16, #tpu.memory_space<vmem>>, %arg6: memref<16x1xf32, #tpu.memory_space<vmem>>, %arg7: memref<1x16x128xbf16, #tpu.memory_space<vmem>>, %arg8: memref<1x16x128xf32, #tpu.memory_space<vmem>>, %arg9: memref<144x128xbf16, #tpu.memory_space<vmem>>) attributes {dimension_semantics = [#tpu.dimension_semantics<parallel>, #tpu.dimension_semantics<parallel>], iteration_bounds = array<i64: 2, 1>, scalar_prefetch = 0 : i64, scratch_operands = 1 : i64, tpu.core_type = #tpu.core_type<tc>, window_params = [{transform_indices = @transform_0, window_bounds = array<i64: 1, 1, 4, 16, 256>}, {pipeline_mode = #tpu.pipeline_mode<synchronous>, transform_indices = @transform_1, window_bounds = array<i64: 16, 144>}, {pipeline_mode = #tpu.pipeline_mode<synchronous>, transform_indices = @transform_2, window_bounds = array<i64: 16, 1>}, {pipeline_mode = #tpu.pipeline_mode<synchronous>, transform_indices = @transform_3, window_bounds = array<i64: 16, 16>}, {pipeline_mode = #tpu.pipeline_mode<synchronous>, transform_indices = @transform_4, window_bounds = array<i64: 16, 1>}, {transform_indices = @transform_5, window_bounds = array<i64: 1, 16, 128>}, {transform_indices = @transform_6, window_bounds = array<i64: 1, 16, 128>}]} {
    %c0 = arith.constant 0 : index
    %c0_0 = arith.constant 0 : index
    %c0_1 = arith.constant 0 : index
    %c0_2 = arith.constant 0 : index
    %c0_3 = arith.constant 0 : index
    %0 = vector.load %arg2[%c0, %c0_0, %c0_1, %c0_2, %c0_3] : memref<1x1x4x16x256xbf16, #tpu.memory_space<vmem>>, vector<1x1x1x16x256xbf16>
    %1 = vector.shape_cast %0 : vector<1x1x1x16x256xbf16> to vector<16x256xbf16>
    %2 = vector.extract_strided_slice %1 {offsets = [0, 0], sizes = [16, 128], strides = [1, 1]} : vector<16x256xbf16> to vector<16x128xbf16>
    %c0_4 = arith.constant 0 : index
    %c0_5 = arith.constant 0 : index
    %3 = vector.load %arg9[%c0_4, %c0_5] : memref<144x128xbf16, #tpu.memory_space<vmem>>, vector<16x128xbf16>
    tpu.vector_store %arg9[%c0_4, %c0_5], %2 {strides = array<i32>} : memref<144x128xbf16, #tpu.memory_space<vmem>>, vector<16x128xbf16>,
    %4 = vector.extract_strided_slice %1 {offsets = [0, 1], sizes = [16, 128], strides = [1, 1]} : vector<16x256xbf16> to vector<16x128xbf16>
    %c32 = arith.constant 32 : index
    %c0_6 = arith.constant 0 : index
    %5 = vector.load %arg9[%c32, %c0_6] : memref<144x128xbf16, #tpu.memory_space<vmem>>, vector<16x128xbf16>
    tpu.vector_store %arg9[%c32, %c0_6], %4 {strides = array<i32>} : memref<144x128xbf16, #tpu.memory_space<vmem>>, vector<16x128xbf16>,
    %6 = vector.extract_strided_slice %1 {offsets = [0, 5], sizes = [16, 128], strides = [1, 1]} : vector<16x256xbf16> to vector<16x128xbf16>
    %c96 = arith.constant 96 : index
    %c0_7 = arith.constant 0 : index
    %7 = vector.load %arg9[%c96, %c0_7] : memref<144x128xbf16, #tpu.memory_space<vmem>>, vector<16x128xbf16>
    tpu.vector_store %arg9[%c96, %c0_7], %6 {strides = array<i32>} : memref<144x128xbf16, #tpu.memory_space<vmem>>, vector<16x128xbf16>,
    %8 = vector.extract_strided_slice %1 {offsets = [0, 6], sizes = [16, 128], strides = [1, 1]} : vector<16x256xbf16> to vector<16x128xbf16>
    %c128 = arith.constant 128 : index
    %c0_8 = arith.constant 0 : index
    %9 = vector.load %arg9[%c128, %c0_8] : memref<144x128xbf16, #tpu.memory_space<vmem>>, vector<16x128xbf16>
    tpu.vector_store %arg9[%c128, %c0_8], %8 {strides = array<i32>} : memref<144x128xbf16, #tpu.memory_space<vmem>>, vector<16x128xbf16>,
    %c0_9 = arith.constant 0 : index
    %c0_10 = arith.constant 0 : index
    %c1 = arith.constant 1 : index
    %c0_11 = arith.constant 0 : index
    %c0_12 = arith.constant 0 : index
    %10 = vector.load %arg2[%c0_9, %c0_10, %c1, %c0_11, %c0_12] : memref<1x1x4x16x256xbf16, #tpu.memory_space<vmem>>, vector<1x1x1x16x256xbf16>
    %11 = vector.shape_cast %10 : vector<1x1x1x16x256xbf16> to vector<16x256xbf16>
    %12 = vector.extract_strided_slice %11 {offsets = [0, 0], sizes = [16, 128], strides = [1, 1]} : vector<16x256xbf16> to vector<16x128xbf16>
    %c16 = arith.constant 16 : index
    %c0_13 = arith.constant 0 : index
    %13 = vector.load %arg9[%c16, %c0_13] : memref<144x128xbf16, #tpu.memory_space<vmem>>, vector<16x128xbf16>
    tpu.vector_store %arg9[%c16, %c0_13], %12 {strides = array<i32>} : memref<144x128xbf16, #tpu.memory_space<vmem>>, vector<16x128xbf16>,
    %14 = vector.extract_strided_slice %11 {offsets = [0, 5], sizes = [16, 128], strides = [1, 1]} : vector<16x256xbf16> to vector<16x128xbf16>
    %c112 = arith.constant 112 : index
    %c0_14 = arith.constant 0 : index
    %15 = vector.load %arg9[%c112, %c0_14] : memref<144x128xbf16, #tpu.memory_space<vmem>>, vector<16x128xbf16>
    tpu.vector_store %arg9[%c112, %c0_14], %14 {strides = array<i32>} : memref<144x128xbf16, #tpu.memory_space<vmem>>, vector<16x128xbf16>,
    %c0_15 = arith.constant 0 : index
    %c0_16 = arith.constant 0 : index
    %c2 = arith.constant 2 : index
    %c0_17 = arith.constant 0 : index
    %c0_18 = arith.constant 0 : index
    %16 = vector.load %arg2[%c0_15, %c0_16, %c2, %c0_17, %c0_18] : memref<1x1x4x16x256xbf16, #tpu.memory_space<vmem>>, vector<1x1x1x16x256xbf16>
    %17 = vector.shape_cast %16 : vector<1x1x1x16x256xbf16> to vector<16x256xbf16>
    %18 = vector.extract_strided_slice %17 {offsets = [0, 0], sizes = [16, 128], strides = [1, 1]} : vector<16x256xbf16> to vector<16x128xbf16>
    %c48 = arith.constant 48 : index
    %c0_19 = arith.constant 0 : index
    %19 = vector.load %arg9[%c48, %c0_19] : memref<144x128xbf16, #tpu.memory_space<vmem>>, vector<16x128xbf16>
    tpu.vector_store %arg9[%c48, %c0_19], %18 {strides = array<i32>} : memref<144x128xbf16, #tpu.memory_space<vmem>>, vector<16x128xbf16>,
    %20 = vector.extract_strided_slice %17 {offsets = [0, 1], sizes = [16, 128], strides = [1, 1]} : vector<16x256xbf16> to vector<16x128xbf16>
    %c80 = arith.constant 80 : index
    %c0_20 = arith.constant 0 : index
    %21 = vector.load %arg9[%c80, %c0_20] : memref<144x128xbf16, #tpu.memory_space<vmem>>, vector<16x128xbf16>
    tpu.vector_store %arg9[%c80, %c0_20], %20 {strides = array<i32>} : memref<144x128xbf16, #tpu.memory_space<vmem>>, vector<16x128xbf16>,
    %c0_21 = arith.constant 0 : index
    %c0_22 = arith.constant 0 : index
    %c3 = arith.constant 3 : index
    %c0_23 = arith.constant 0 : index
    %c0_24 = arith.constant 0 : index
    %22 = vector.load %arg2[%c0_21, %c0_22, %c3, %c0_23, %c0_24] : memref<1x1x4x16x256xbf16, #tpu.memory_space<vmem>>, vector<1x1x1x16x256xbf16>
    %23 = vector.shape_cast %22 : vector<1x1x1x16x256xbf16> to vector<16x256xbf16>
    %24 = vector.extract_strided_slice %23 {offsets = [0, 0], sizes = [16, 128], strides = [1, 1]} : vector<16x256xbf16> to vector<16x128xbf16>
    %c64 = arith.constant 64 : index
    %c0_25 = arith.constant 0 : index
    %25 = vector.load %arg9[%c64, %c0_25] : memref<144x128xbf16, #tpu.memory_space<vmem>>, vector<16x128xbf16>
    tpu.vector_store %arg9[%c64, %c0_25], %24 {strides = array<i32>} : memref<144x128xbf16, #tpu.memory_space<vmem>>, vector<16x128xbf16>,
    %c0_26 = arith.constant 0 : index
    %c0_27 = arith.constant 0 : index
    %26 = vector.load %arg3[%c0_26, %c0_27] : memref<16x144xbf16, #tpu.memory_space<vmem>>, vector<16x144xbf16>
    %c0_28 = arith.constant 0 : index
    %c0_29 = arith.constant 0 : index
    %27 = vector.load %arg9[%c0_28, %c0_29] : memref<144x128xbf16, #tpu.memory_space<vmem>>, vector<144x128xbf16>
    %cst = arith.constant dense<0.000000e+00> : vector<16x128xf32>
    %28 = tpu.matmul %26, %27, %cst {dimension_numbers = #tpu.dot_dimension_numbers<[1], [0], [0], [1], [0, 0, 1, 1], [], []>} : vector<16x144xbf16>, vector<144x128xbf16>, vector<16x128xf32> -> vector<16x128xf32>
    %c0_30 = arith.constant 0 : index
    %c0_31 = arith.constant 0 : index
    %29 = vector.load %arg4[%c0_30, %c0_31] : memref<16x1xf32, #tpu.memory_space<vmem>>, vector<16x1xf32>
    %30 = vector.broadcast %29 : vector<16x1xf32> to vector<16x128xf32>
    %31 = arith.addf %28, %30 : vector<16x128xf32>
    %32 = arith.negf %31 : vector<16x128xf32>
    %33 = math.exp %32 : vector<16x128xf32>
    %cst_32 = arith.constant 1.000000e+00 : f32
    %34 = vector.broadcast %cst_32 : f32 to vector<16x128xf32>
    %35 = arith.addf %34, %33 : vector<16x128xf32>
    %36 = arith.divf %34, %35 : vector<16x128xf32>
    %37 = arith.mulf %31, %36 : vector<16x128xf32>
    %38 = arith.truncf %37 : vector<16x128xf32> to vector<16x128xbf16>
    %c0_33 = arith.constant 0 : index
    %c0_34 = arith.constant 0 : index
    %c0_35 = arith.constant 0 : index
    %39 = vector.load %arg7[%c0_33, %c0_34, %c0_35] : memref<1x16x128xbf16, #tpu.memory_space<vmem>>, vector<1x16x128xbf16>
    %40 = vector.shape_cast %39 : vector<1x16x128xbf16> to vector<16x128xbf16>
    %41 = vector.shape_cast %38 : vector<16x128xbf16> to vector<1x16x128xbf16>
    tpu.vector_store %arg7[%c0_33, %c0_34, %c0_35], %41 {strides = array<i32>} : memref<1x16x128xbf16, #tpu.memory_space<vmem>>, vector<1x16x128xbf16>,
    %c0_36 = arith.constant 0 : index
    %c0_37 = arith.constant 0 : index
    %42 = vector.load %arg5[%c0_36, %c0_37] : memref<16x16xbf16, #tpu.memory_space<vmem>>, vector<16x16xbf16>
    %cst_38 = arith.constant dense<0.000000e+00> : vector<16x128xf32>
    %43 = tpu.matmul %42, %38, %cst_38 {dimension_numbers = #tpu.dot_dimension_numbers<[1], [0], [0], [1], [0, 0, 1, 1], [], []>} : vector<16x16xbf16>, vector<16x128xbf16>, vector<16x128xf32> -> vector<16x128xf32>
    %c0_39 = arith.constant 0 : index
    %c0_40 = arith.constant 0 : index
    %44 = vector.load %arg6[%c0_39, %c0_40] : memref<16x1xf32, #tpu.memory_space<vmem>>, vector<16x1xf32>
    %45 = vector.broadcast %44 : vector<16x1xf32> to vector<16x128xf32>
    %46 = arith.addf %43, %45 : vector<16x128xf32>
    %c0_41 = arith.constant 0 : index
    %c0_42 = arith.constant 0 : index
    %c0_43 = arith.constant 0 : index
    %47 = vector.load %arg8[%c0_41, %c0_42, %c0_43] : memref<1x16x128xf32, #tpu.memory_space<vmem>>, vector<1x16x128xf32>
    %48 = vector.shape_cast %47 : vector<1x16x128xf32> to vector<16x128xf32>
    %49 = vector.shape_cast %46 : vector<16x128xf32> to vector<1x16x128xf32>
    tpu.vector_store %arg8[%c0_41, %c0_42, %c0_43], %49 {strides = array<i32>} : memref<1x16x128xf32, #tpu.memory_space<vmem>>, vector<1x16x128xf32>,
    return
  }
  func.func @transform_0(%arg0: i32, %arg1: i32) -> (i32, i32, i32, i32, i32) {
    %c0_i32 = arith.constant 0 : i32
    %c0_i32_0 = arith.constant 0 : i32
    %c0_i32_1 = arith.constant 0 : i32
    %c0_i32_2 = arith.constant 0 : i32
    return %arg0, %arg1, %c0_i32, %c0_i32_0, %c0_i32_1 : i32, i32, i32, i32, i32
  }
  func.func @transform_1(%arg0: i32, %arg1: i32) -> (i32, i32) {
    %c0_i32 = arith.constant 0 : i32
    %c0_i32_0 = arith.constant 0 : i32
    %c0_i32_1 = arith.constant 0 : i32
    return %c0_i32, %c0_i32_0 : i32, i32
  }
  func.func @transform_2(%arg0: i32, %arg1: i32) -> (i32, i32) {
    %c0_i32 = arith.constant 0 : i32
    %c0_i32_0 = arith.constant 0 : i32
    %c0_i32_1 = arith.constant 0 : i32
    return %c0_i32, %c0_i32_0 : i32, i32
  }
  func.func @transform_3(%arg0: i32, %arg1: i32) -> (i32, i32) {
    %c0_i32 = arith.constant 0 : i32
    %c0_i32_0 = arith.constant 0 : i32
    %c0_i32_1 = arith.constant 0 : i32
    return %c0_i32, %c0_i32_0 : i32, i32
  }
  func.func @transform_4(%arg0: i32, %arg1: i32) -> (i32, i32) {
    %c0_i32 = arith.constant 0 : i32
    %c0_i32_0 = arith.constant 0 : i32
    %c0_i32_1 = arith.constant 0 : i32
    return %c0_i32, %c0_i32_0 : i32, i32
  }
  func.func @transform_5(%arg0: i32, %arg1: i32) -> (i32, i32, i32) {
    %c0_i32 = arith.constant 0 : i32
    %c0_i32_0 = arith.constant 0 : i32
    return %arg0, %c0_i32, %arg1 : i32, i32, i32
  }
  func.func @transform_6(%arg0: i32, %arg1: i32) -> (i32, i32, i32) {
    %c0_i32 = arith.constant 0 : i32
    %c0_i32_0 = arith.constant 0 : i32
    return %arg0, %c0_i32, %arg1 : i32, i32, i32
  }
}

module attributes {stable_mosaic.version = 11 : i64} {
  func.func @_encoder_layer_kernel(%arg0: i32, %arg1: i32, %arg2: memref<1x1x4x16x256xbf16, #tpu.memory_space<vmem>>, %arg3: memref<32x144xbf16, #tpu.memory_space<vmem>>, %arg4: memref<32x1xf32, #tpu.memory_space<vmem>>, %arg5: memref<32x32xbf16, #tpu.memory_space<vmem>>, %arg6: memref<32x1xf32, #tpu.memory_space<vmem>>, %arg7: memref<1x32x128xbf16, #tpu.memory_space<vmem>>, %arg8: memref<1x32x128xf32, #tpu.memory_space<vmem>>, %arg9: memref<144x128xbf16, #tpu.memory_space<vmem>>) attributes {dimension_semantics = [#tpu.dimension_semantics<parallel>, #tpu.dimension_semantics<parallel>], iteration_bounds = array<i64: 2, 1>, scalar_prefetch = 0 : i64, scratch_operands = 1 : i64, tpu.core_type = #tpu.core_type<tc>, window_params = [{transform_indices = @transform_0, window_bounds = array<i64: 1, 1, 4, 16, 256>}, {pipeline_mode = #tpu.pipeline_mode<synchronous>, transform_indices = @transform_1, window_bounds = array<i64: 32, 144>}, {pipeline_mode = #tpu.pipeline_mode<synchronous>, transform_indices = @transform_2, window_bounds = array<i64: 32, 1>}, {pipeline_mode = #tpu.pipeline_mode<synchronous>, transform_indices = @transform_3, window_bounds = array<i64: 32, 32>}, {pipeline_mode = #tpu.pipeline_mode<synchronous>, transform_indices = @transform_4, window_bounds = array<i64: 32, 1>}, {transform_indices = @transform_5, window_bounds = array<i64: 1, 32, 128>}, {transform_indices = @transform_6, window_bounds = array<i64: 1, 32, 128>}]} {
    %c0 = arith.constant 0 : index
    %c0_0 = arith.constant 0 : index
    %c0_1 = arith.constant 0 : index
    %c0_2 = arith.constant 0 : index
    %c0_3 = arith.constant 0 : index
    %0 = vector.load %arg2[%c0, %c0_0, %c0_1, %c0_2, %c0_3] : memref<1x1x4x16x256xbf16, #tpu.memory_space<vmem>>, vector<1x1x1x16x256xbf16>
    %1 = vector.shape_cast %0 : vector<1x1x1x16x256xbf16> to vector<16x256xbf16>
    %2 = vector.extract_strided_slice %1 {offsets = [0, 0], sizes = [16, 128], strides = [1, 1]} : vector<16x256xbf16> to vector<16x128xbf16>
    %c0_4 = arith.constant 0 : index
    %c0_5 = arith.constant 0 : index
    %3 = vector.load %arg9[%c0_4, %c0_5] : memref<144x128xbf16, #tpu.memory_space<vmem>>, vector<16x128xbf16>
    tpu.vector_store %arg9[%c0_4, %c0_5], %2 {strides = array<i32>} : memref<144x128xbf16, #tpu.memory_space<vmem>>, vector<16x128xbf16>,
    %4 = vector.extract_strided_slice %1 {offsets = [0, 1], sizes = [16, 128], strides = [1, 1]} : vector<16x256xbf16> to vector<16x128xbf16>
    %c32 = arith.constant 32 : index
    %c0_6 = arith.constant 0 : index
    %5 = vector.load %arg9[%c32, %c0_6] : memref<144x128xbf16, #tpu.memory_space<vmem>>, vector<16x128xbf16>
    tpu.vector_store %arg9[%c32, %c0_6], %4 {strides = array<i32>} : memref<144x128xbf16, #tpu.memory_space<vmem>>, vector<16x128xbf16>,
    %6 = vector.extract_strided_slice %1 {offsets = [0, 3], sizes = [16, 128], strides = [1, 1]} : vector<16x256xbf16> to vector<16x128xbf16>
    %c96 = arith.constant 96 : index
    %c0_7 = arith.constant 0 : index
    %7 = vector.load %arg9[%c96, %c0_7] : memref<144x128xbf16, #tpu.memory_space<vmem>>, vector<16x128xbf16>
    tpu.vector_store %arg9[%c96, %c0_7], %6 {strides = array<i32>} : memref<144x128xbf16, #tpu.memory_space<vmem>>, vector<16x128xbf16>,
    %8 = vector.extract_strided_slice %1 {offsets = [0, 4], sizes = [16, 128], strides = [1, 1]} : vector<16x256xbf16> to vector<16x128xbf16>
    %c128 = arith.constant 128 : index
    %c0_8 = arith.constant 0 : index
    %9 = vector.load %arg9[%c128, %c0_8] : memref<144x128xbf16, #tpu.memory_space<vmem>>, vector<16x128xbf16>
    tpu.vector_store %arg9[%c128, %c0_8], %8 {strides = array<i32>} : memref<144x128xbf16, #tpu.memory_space<vmem>>, vector<16x128xbf16>,
    %c0_9 = arith.constant 0 : index
    %c0_10 = arith.constant 0 : index
    %c1 = arith.constant 1 : index
    %c0_11 = arith.constant 0 : index
    %c0_12 = arith.constant 0 : index
    %10 = vector.load %arg2[%c0_9, %c0_10, %c1, %c0_11, %c0_12] : memref<1x1x4x16x256xbf16, #tpu.memory_space<vmem>>, vector<1x1x1x16x256xbf16>
    %11 = vector.shape_cast %10 : vector<1x1x1x16x256xbf16> to vector<16x256xbf16>
    %12 = vector.extract_strided_slice %11 {offsets = [0, 0], sizes = [16, 128], strides = [1, 1]} : vector<16x256xbf16> to vector<16x128xbf16>
    %c16 = arith.constant 16 : index
    %c0_13 = arith.constant 0 : index
    %13 = vector.load %arg9[%c16, %c0_13] : memref<144x128xbf16, #tpu.memory_space<vmem>>, vector<16x128xbf16>
    tpu.vector_store %arg9[%c16, %c0_13], %12 {strides = array<i32>} : memref<144x128xbf16, #tpu.memory_space<vmem>>, vector<16x128xbf16>,
    %14 = vector.extract_strided_slice %11 {offsets = [0, 3], sizes = [16, 128], strides = [1, 1]} : vector<16x256xbf16> to vector<16x128xbf16>
    %c112 = arith.constant 112 : index
    %c0_14 = arith.constant 0 : index
    %15 = vector.load %arg9[%c112, %c0_14] : memref<144x128xbf16, #tpu.memory_space<vmem>>, vector<16x128xbf16>
    tpu.vector_store %arg9[%c112, %c0_14], %14 {strides = array<i32>} : memref<144x128xbf16, #tpu.memory_space<vmem>>, vector<16x128xbf16>,
    %c0_15 = arith.constant 0 : index
    %c0_16 = arith.constant 0 : index
    %c2 = arith.constant 2 : index
    %c0_17 = arith.constant 0 : index
    %c0_18 = arith.constant 0 : index
    %16 = vector.load %arg2[%c0_15, %c0_16, %c2, %c0_17, %c0_18] : memref<1x1x4x16x256xbf16, #tpu.memory_space<vmem>>, vector<1x1x1x16x256xbf16>
    %17 = vector.shape_cast %16 : vector<1x1x1x16x256xbf16> to vector<16x256xbf16>
    %18 = vector.extract_strided_slice %17 {offsets = [0, 0], sizes = [16, 128], strides = [1, 1]} : vector<16x256xbf16> to vector<16x128xbf16>
    %c48 = arith.constant 48 : index
    %c0_19 = arith.constant 0 : index
    %19 = vector.load %arg9[%c48, %c0_19] : memref<144x128xbf16, #tpu.memory_space<vmem>>, vector<16x128xbf16>
    tpu.vector_store %arg9[%c48, %c0_19], %18 {strides = array<i32>} : memref<144x128xbf16, #tpu.memory_space<vmem>>, vector<16x128xbf16>,
    %20 = vector.extract_strided_slice %17 {offsets = [0, 1], sizes = [16, 128], strides = [1, 1]} : vector<16x256xbf16> to vector<16x128xbf16>
    %c80 = arith.constant 80 : index
    %c0_20 = arith.constant 0 : index
    %21 = vector.load %arg9[%c80, %c0_20] : memref<144x128xbf16, #tpu.memory_space<vmem>>, vector<16x128xbf16>
    tpu.vector_store %arg9[%c80, %c0_20], %20 {strides = array<i32>} : memref<144x128xbf16, #tpu.memory_space<vmem>>, vector<16x128xbf16>,
    %c0_21 = arith.constant 0 : index
    %c0_22 = arith.constant 0 : index
    %c3 = arith.constant 3 : index
    %c0_23 = arith.constant 0 : index
    %c0_24 = arith.constant 0 : index
    %22 = vector.load %arg2[%c0_21, %c0_22, %c3, %c0_23, %c0_24] : memref<1x1x4x16x256xbf16, #tpu.memory_space<vmem>>, vector<1x1x1x16x256xbf16>
    %23 = vector.shape_cast %22 : vector<1x1x1x16x256xbf16> to vector<16x256xbf16>
    %24 = vector.extract_strided_slice %23 {offsets = [0, 0], sizes = [16, 128], strides = [1, 1]} : vector<16x256xbf16> to vector<16x128xbf16>
    %c64 = arith.constant 64 : index
    %c0_25 = arith.constant 0 : index
    %25 = vector.load %arg9[%c64, %c0_25] : memref<144x128xbf16, #tpu.memory_space<vmem>>, vector<16x128xbf16>
    tpu.vector_store %arg9[%c64, %c0_25], %24 {strides = array<i32>} : memref<144x128xbf16, #tpu.memory_space<vmem>>, vector<16x128xbf16>,
    %c0_26 = arith.constant 0 : index
    %c0_27 = arith.constant 0 : index
    %26 = vector.load %arg3[%c0_26, %c0_27] : memref<32x144xbf16, #tpu.memory_space<vmem>>, vector<32x144xbf16>
    %c0_28 = arith.constant 0 : index
    %c0_29 = arith.constant 0 : index
    %27 = vector.load %arg9[%c0_28, %c0_29] : memref<144x128xbf16, #tpu.memory_space<vmem>>, vector<144x128xbf16>
    %cst = arith.constant dense<0.000000e+00> : vector<32x128xf32>
    %28 = tpu.matmul %26, %27, %cst {dimension_numbers = #tpu.dot_dimension_numbers<[1], [0], [0], [1], [0, 0, 1, 1], [], []>} : vector<32x144xbf16>, vector<144x128xbf16>, vector<32x128xf32> -> vector<32x128xf32>
    %c0_30 = arith.constant 0 : index
    %c0_31 = arith.constant 0 : index
    %29 = vector.load %arg4[%c0_30, %c0_31] : memref<32x1xf32, #tpu.memory_space<vmem>>, vector<32x1xf32>
    %30 = vector.broadcast %29 : vector<32x1xf32> to vector<32x128xf32>
    %31 = arith.addf %28, %30 : vector<32x128xf32>
    %32 = arith.negf %31 : vector<32x128xf32>
    %33 = math.exp %32 : vector<32x128xf32>
    %cst_32 = arith.constant 1.000000e+00 : f32
    %34 = vector.broadcast %cst_32 : f32 to vector<32x128xf32>
    %35 = arith.addf %34, %33 : vector<32x128xf32>
    %36 = arith.divf %34, %35 : vector<32x128xf32>
    %37 = arith.mulf %31, %36 : vector<32x128xf32>
    %38 = arith.truncf %37 : vector<32x128xf32> to vector<32x128xbf16>
    %c0_33 = arith.constant 0 : index
    %c0_34 = arith.constant 0 : index
    %c0_35 = arith.constant 0 : index
    %39 = vector.load %arg7[%c0_33, %c0_34, %c0_35] : memref<1x32x128xbf16, #tpu.memory_space<vmem>>, vector<1x32x128xbf16>
    %40 = vector.shape_cast %39 : vector<1x32x128xbf16> to vector<32x128xbf16>
    %41 = vector.shape_cast %38 : vector<32x128xbf16> to vector<1x32x128xbf16>
    tpu.vector_store %arg7[%c0_33, %c0_34, %c0_35], %41 {strides = array<i32>} : memref<1x32x128xbf16, #tpu.memory_space<vmem>>, vector<1x32x128xbf16>,
    %c0_36 = arith.constant 0 : index
    %c0_37 = arith.constant 0 : index
    %42 = vector.load %arg5[%c0_36, %c0_37] : memref<32x32xbf16, #tpu.memory_space<vmem>>, vector<32x32xbf16>
    %cst_38 = arith.constant dense<0.000000e+00> : vector<32x128xf32>
    %43 = tpu.matmul %42, %38, %cst_38 {dimension_numbers = #tpu.dot_dimension_numbers<[1], [0], [0], [1], [0, 0, 1, 1], [], []>} : vector<32x32xbf16>, vector<32x128xbf16>, vector<32x128xf32> -> vector<32x128xf32>
    %c0_39 = arith.constant 0 : index
    %c0_40 = arith.constant 0 : index
    %44 = vector.load %arg6[%c0_39, %c0_40] : memref<32x1xf32, #tpu.memory_space<vmem>>, vector<32x1xf32>
    %45 = vector.broadcast %44 : vector<32x1xf32> to vector<32x128xf32>
    %46 = arith.addf %43, %45 : vector<32x128xf32>
    %c0_41 = arith.constant 0 : index
    %c0_42 = arith.constant 0 : index
    %c0_43 = arith.constant 0 : index
    %47 = vector.load %arg8[%c0_41, %c0_42, %c0_43] : memref<1x32x128xf32, #tpu.memory_space<vmem>>, vector<1x32x128xf32>
    %48 = vector.shape_cast %47 : vector<1x32x128xf32> to vector<32x128xf32>
    %49 = vector.shape_cast %46 : vector<32x128xf32> to vector<1x32x128xf32>
    tpu.vector_store %arg8[%c0_41, %c0_42, %c0_43], %49 {strides = array<i32>} : memref<1x32x128xf32, #tpu.memory_space<vmem>>, vector<1x32x128xf32>,
    return
  }
  func.func @transform_0(%arg0: i32, %arg1: i32) -> (i32, i32, i32, i32, i32) {
    %c0_i32 = arith.constant 0 : i32
    %c0_i32_0 = arith.constant 0 : i32
    %c0_i32_1 = arith.constant 0 : i32
    %c0_i32_2 = arith.constant 0 : i32
    return %arg0, %arg1, %c0_i32, %c0_i32_0, %c0_i32_1 : i32, i32, i32, i32, i32
  }
  func.func @transform_1(%arg0: i32, %arg1: i32) -> (i32, i32) {
    %c0_i32 = arith.constant 0 : i32
    %c0_i32_0 = arith.constant 0 : i32
    %c0_i32_1 = arith.constant 0 : i32
    return %c0_i32, %c0_i32_0 : i32, i32
  }
  func.func @transform_2(%arg0: i32, %arg1: i32) -> (i32, i32) {
    %c0_i32 = arith.constant 0 : i32
    %c0_i32_0 = arith.constant 0 : i32
    %c0_i32_1 = arith.constant 0 : i32
    return %c0_i32, %c0_i32_0 : i32, i32
  }
  func.func @transform_3(%arg0: i32, %arg1: i32) -> (i32, i32) {
    %c0_i32 = arith.constant 0 : i32
    %c0_i32_0 = arith.constant 0 : i32
    %c0_i32_1 = arith.constant 0 : i32
    return %c0_i32, %c0_i32_0 : i32, i32
  }
  func.func @transform_4(%arg0: i32, %arg1: i32) -> (i32, i32) {
    %c0_i32 = arith.constant 0 : i32
    %c0_i32_0 = arith.constant 0 : i32
    %c0_i32_1 = arith.constant 0 : i32
    return %c0_i32, %c0_i32_0 : i32, i32
  }
  func.func @transform_5(%arg0: i32, %arg1: i32) -> (i32, i32, i32) {
    %c0_i32 = arith.constant 0 : i32
    %c0_i32_0 = arith.constant 0 : i32
    return %arg0, %c0_i32, %arg1 : i32, i32, i32
  }
  func.func @transform_6(%arg0: i32, %arg1: i32) -> (i32, i32, i32) {
    %c0_i32 = arith.constant 0 : i32
    %c0_i32_0 = arith.constant 0 : i32
    return %arg0, %c0_i32, %arg1 : i32, i32, i32
  }
}

</mosaic_0001>

<bundles_post_ra>
// kernel: cond_feature_encoder_forward.3
= control target key start
LH: loop header
LB: loop body
LE: loop exit
PB: predicated region body
PF: predicated region fallthrough
CT: control target
= control target key end

     0   :  { %s793_s21 = smov 0   ;;  %s795_s22 = smov 0   ;;  %s866_s0 = inlined_call_operand.vmem [shape: bf16[2,1,4,16,256], index: 0, kind: input, shape index: {}]   ;;  %s867_s1 = inlined_call_operand.vmem [shape: bf16[8,144], index: 1, kind: input, shape index: {}]   ;;  %s868_s2 = inlined_call_operand.vmem [shape: f32[8,1], index: 2, kind: input, shape index: {}]   ;;  %s869_s3 = inlined_call_operand.vmem [shape: bf16[8,8], index: 3, kind: input, shape index: {}]   ;;  %s870_s4 = inlined_call_operand.vmem [shape: f32[8,1], index: 4, kind: input, shape index: {}]   ;;  %s871_s5 = inlined_call_operand.vmem [shape: bf16[2,8,128], index: 5, kind: output, shape index: {0}]   ;;  %s872_s6 = inlined_call_operand.vmem [shape: f32[2,8,128], index: 6, kind: output, shape index: {1}]  }
   0x1   :  { %s797_s23 = smov 0  }
   0x2 LB: > { %s29_s24 = sadd.s32 1, %s746_s22  ;;  %p646_p0 = scmp.ge.s32.totalorder %s750_s23, 1  ;;  %s750_s23 = sphi %s797_s23, %s17_s23   ;;  %s746_s22 = sphi %s795_s22, %s874_s22   ;;  %s742_s21 = sphi %s793_s21, %s873_s21  }
   0x3   : > { %p31_p1 = scmp.ge.s32.totalorder %s29_s24, 2  ;;  %p237_p2 = scmp.lt.s32.totalorder %s750_s23, 3 }
   0x5   : > { %s876_s24 = smov (%p31_p1, %s29_s24), 0  ;;  %p238_p3 = pnand %p646_p0, %p237_p2 }
   0x6   : > { %p280_p4 = scmp.lt.s32.totalorder (!%p238_p3), %s742_s21, 1  ;;  %v752_v0 = vmov (!%p238_p3), 0   ;;  %s753_s29 = smov (!%p238_p3), 127   ;;  %v390_v7 = vld [vmem:[%s867_s1] sm:$0xff] (!%p238_p3)  ;;  %vm412_vm0 = vcmask (!%p238_p3), 130048   ;;  %vm320_vm1 = vcmask (!%p238_p3), 1039360  }
   0x7   : > { %241 = sbr.rel (%p238_p3) target bundleno = 628 (0x274), region = 40  ;;  %416 = vmatprep.subr.bf16.mxu0 (!%p238_p3), %v752_v0  ;;  %710 = vset.pattern.permute.xlu0 (!%p238_p3), %v752_v0  ;;  %s754_s30 = smov (!%p238_p3), 119   ;;  %v665_v8 = vcombine.high (!%p238_p3), %v390_v7, %v390_v7  ;;  %v400_v9 = vld [vmem:[%s868_s2] sm:$0xff] (!%p238_p3)  ;;  %vm328_vm2 = vcmask (!%p238_p3), 973824   ;;  %vm336_vm3 = vcmask (!%p238_p3), 965632   ;;  %v664_v26 = vcombine.low (!%p238_p3), %v390_v7, %v390_v7 }
   0x8   : > { %711 = vset.pattern.permute.xlu1 (!%p238_p3), %v752_v0  ;;  %s755_s9 = smov (!%p238_p3), 118   ;;  %v756_v27 = vmov (!%p238_p3), 0.0   ;;  %vm757_vm4 = vmmov (!%p238_p3), 0   ;;  %v466_v28 = vld [vmem:[%s870_s4] sm:$0xff] (!%p238_p3)  ;;  %vm476_vm5 = vcmask (!%p238_p3), 1043456   ;;  %vm472_vm6 = vcmask (!%p238_p3), 64512  }
   0x9   : > { %666 = vmatprep.mubr.msk.bf16.mxu0 (!%p238_p3), %vm412_vm0, %v665_v8  ;;  %674 = vmatprep.subr.bf16.mxu1 (!%p238_p3), %v756_v27  ;;  %v465_v42 = vld [vmem:[%s869_s3] sm:$0xf] (!%p238_p3) }
   0xa   : > { %676 = vmatprep.mubr.msk.bf16.mxu1 (!%p238_p3), %vm757_vm4, %v756_v27 }
   0xe   : > { %s878_s21 = smov (!%p280_p4, %s742_s21), 1 }
   0xf   : > { %s671_s25 = sshll.u32 %s878_s21, 6  ;;  %s649_s14 = sshll.u32 %s878_s21, 2 }
  0x10   : > { %s820_s28 = scalar_lea.vmem %s866_s0, %s671_s25  ;;  %s295_s17 = scalar_lea.vmem %s871_s5, %s649_s14 }
  0x11   : > { %v712_v1 = vld [vmem:[%s820_s28] ss:$8 sps:$4 sm:$0xff]   ;;  %v714_v2 = vld [vmem:[%s820_s28 + $0x4] ss:$8 sps:$4 sm:$0xff]   ;;  %v720_v5 = vld [vmem:[%s820_s28 + $0x10] ss:$8 sps:$4 sm:$0xff]  }
  0x12   : > { %316 = vrot.lane.b32.xlu0 %v712_v1, %s753_s29  ;;  %v715_v3 = vld [vmem:[%s820_s28 + $0x20] ss:$8 sps:$4 sm:$0xff]   ;;  %417 = vmatpush1.bf16.msra.mxu0 %v712_v1  ;;  %v717_v4 = vld [vmem:[%s820_s28 + $0x24] ss:$8 sps:$4 sm:$0xff]   ;;  %v718_v6 = vld [vmem:[%s820_s28 + $0x14] ss:$8 sps:$4 sm:$0xff]  }
  0x13   : > { %418 = vmatprep.subr.bf16.mxu0 %v752_v0  ;;  %373 = vrot.lane.b32.xlu1 %v715_v3, %s753_s29  ;;  %v721_v15 = vld [vmem:[%s820_s28 + $0x30] ss:$8 sps:$4 sm:$0xff]   ;;  %s650_s20 = sshll.u32 %s878_s21, 3 }
  0x14   : > { %s302_s27 = scalar_lea.vmem %s872_s6, %s650_s20 }
  0x16   : > { %318 = vrot.lane.b32.xlu0 %v714_v2, %s753_s29  ;;  %419 = vmatpush1.bf16.msra.mxu0 %v720_v5 }
  0x17   : > { %420 = vmatprep.subr.bf16.mxu0 %v752_v0  ;;  %375 = vrot.lane.b32.xlu1 %v717_v4, %s753_s29 }
  0x1a   : > { %324 = vrot.lane.b32.xlu0 %v712_v1, %s754_s30 }
  0x1b   : > { %326 = vrot.lane.b32.xlu1 %v714_v2, %s754_s30 }
  0x1e   : > { %353 = vrot.lane.b32.xlu0 %v720_v5, %s754_s30 }
  0x1f   : > { %355 = vrot.lane.b32.xlu1 %v718_v6, %s754_s30 }
  0x22   : > { %332 = vrot.lane.b32.xlu0 %v712_v1, %s755_s9 }
  0x23   : > { %334 = vrot.lane.b32.xlu1 %v714_v2, %s755_s9 }
  0x26   : > { %403 = vperm.xlu0 %710, %v400_v9  }
  0x27   : > { %469 = vperm.xlu1 %711, %v466_v28  }
  0x84   : > { %v317_v10 = vpop.permute.xlu0 %316 }
  0x85   : > { %v374_v11 = vpop.permute.xlu1 %373 }
  0x88   : > { %v319_v12 = vpop.permute.xlu0 %318 }
  0x89   : > { %v321_v13 = vsel %vm320_vm1, %v317_v10, %v319_v12  ;;  %v376_v14 = vpop.permute.xlu1 %375 }
  0x8a   : > { %421 = vmatpush1.bf16.msra.mxu0 %v321_v13  ;;  %v377_v18 = vsel %vm320_vm1, %v374_v11, %v376_v14 }
  0x8b   : > { %422 = vmatprep.subr.bf16.mxu0 %v752_v0 }
  0x8c   : > { %v325_v17 = vpop.permute.xlu0 %324 }
  0x8d   : > { %v327_v16 = vpop.permute.xlu1 %326 }
  0x8e   : > { %423 = vmatpush1.bf16.msra.mxu0 %v715_v3  ;;  %v329_v21 = vsel %vm328_vm2, %v325_v17, %v327_v16 }
  0x8f   : > { %424 = vmatprep.subr.bf16.mxu0 %v752_v0 }
  0x90   : > { %v354_v20 = vpop.permute.xlu0 %353 }
  0x91   : > { %v356_v19 = vpop.permute.xlu1 %355 }
  0x92   : > { %425 = vmatpush1.bf16.msra.mxu0 %v721_v15  ;;  %v357_v22 = vsel %vm328_vm2, %v354_v20, %v356_v19 }
  0x93   : > { %426 = vmatprep.subr.bf16.mxu0 %v752_v0 }
  0x94   : > { %v333_v24 = vpop.permute.xlu0 %332 }
  0x95   : > { %v335_v23 = vpop.permute.xlu1 %334 }
  0x96   : > { %427 = vmatpush1.bf16.msra.mxu0 %v377_v18  ;;  %v337_v25 = vsel %vm336_vm3, %v333_v24, %v335_v23 }
  0x97   : > { %428 = vmatprep.subr.bf16.mxu0 %v752_v0 }
  0x9a   : > { %429 = vmatpush1.bf16.msra.mxu0 %v329_v21 }
  0x9b   : > { %430 = vmatprep.subr.bf16.mxu0 %v752_v0 }
  0x9e   : > { %431 = vmatpush1.bf16.msra.mxu0 %v357_v22 }
  0x9f   : > { %432 = vmatprep.subr.bf16.mxu0 %v752_v0 }
  0xa2   : > { %433 = vmatpush1.bf16.msra.mxu0 %v337_v25 }
  0xa5   : > { %449 = vmatmul.mubr.bf16.vlgmr.msra.gmra.mrb[0].mxu0 %v664_v26  ;;  %v404_v29 = vpop.permute.xlu0 %403 }
  0xa6   : > { %v470_v43 = vpop.permute.xlu1 %469 }
 0x178   : > { %v450_v30 = vpop.f32.mrb[0].mxu0 }
 0x179   : > { %v451_v31 = vadd.f32 %v450_v30, %v404_v29  ;;  %v452_v32 = vpop.f32.mrb[1].mxu0 }
 0x17a   : > { %v453_v33 = vpop.f32.mrb[2].mxu0 }
 0x17b   : > { %v667_v34 = vmul.f32 -1.442695, %v451_v31  ;;  %v454_v35 = vpop.f32.mrb[3].mxu0 }
 0x17d   : > { %724 = vpow2.f32 %v667_v34 }
 0x187   : > { %v725_v36 = vpop.eup %724 }
 0x188   : > { %v459_v37 = vadd.f32 1.0, %v725_v36 }
 0x18a   : > { %726 = vrcp.f32 %v459_v37 }
 0x194   : > { %v727_v38 = vpop.eup %726 }
 0x195   : > { %v462_v39 = vmul.f32 %v727_v38, %v451_v31 }
 0x197   : > { %v463_v40 = vpack.c.bf16 %v462_v39, %v462_v39 }
 0x199   : > { %464 = vst [vmem:[%s295_s17] sm:$0xf] %v463_v40  ;;  %v478_v41 = vsel %vm476_vm5, %v463_v40, 0 }
 0x19a   : > { %675 = vmatpush3.bf16.msra.mxu1 %v478_v41 }
 0x19d   : > { %677 = vmatmul.mubr.msk.bf16.vlgmr.msra.gmra.mrb[0].mxu1 %vm472_vm6, %v465_v42 }
 0x270   : > { %v514_v44 = vpop.f32.mrb[0].mxu1 }
 0x271   : > { %v515_v45 = vadd.f32 %v514_v44, %v470_v43  ;;  %v678_v46 = vpop.f32.mrb[1].mxu1 }
 0x272   : > { %v517_v47 = vpop.f32.mrb[2].mxu1 }
 0x273   : > { %520 = vst [vmem:[%s302_s27] sm:$0xff] %v515_v45  ;;  %v679_v48 = vpop.f32.mrb[3].mxu1 }
 0x274 PF: > { %s17_s23 = sadd.s32 1, %s750_s23   ;;  %s873_s21 = smov %s746_s22 }
 0x275   : > { %p14_p5 = scmp.ge.s32.totalorder %s17_s23, 4   ;;  %s874_s22 = smov %s876_s24 }
 0x277   :  { %16 = sbr.rel (!%p14_p5) target bundleno = 2 (0x2), region = 85 }

// kernel: cond_feature_encoder_forward.4
= control target key start
LH: loop header
LB: loop body
LE: loop exit
PB: predicated region body
PF: predicated region fallthrough
CT: control target
= control target key end

     0   :  { %s865_s21 = smov 0   ;;  %s867_s22 = smov 0   ;;  %s949_s0 = inlined_call_operand.vmem [shape: bf16[2,1,4,16,256], index: 0, kind: input, shape index: {}]   ;;  %s950_s1 = inlined_call_operand.vmem [shape: bf16[16,144], index: 1, kind: input, shape index: {}]   ;;  %s951_s2 = inlined_call_operand.vmem [shape: f32[16,1], index: 2, kind: input, shape index: {}]   ;;  %s952_s3 = inlined_call_operand.vmem [shape: bf16[16,16], index: 3, kind: input, shape index: {}]   ;;  %s953_s4 = inlined_call_operand.vmem [shape: f32[16,1], index: 4, kind: input, shape index: {}]   ;;  %s954_s5 = inlined_call_operand.vmem [shape: bf16[2,16,128], index: 5, kind: output, shape index: {0}]   ;;  %s955_s6 = inlined_call_operand.vmem [shape: f32[2,16,128], index: 6, kind: output, shape index: {1}]  }
   0x1   :  { %s869_s23 = smov 0  }
   0x2 LB: > { %s29_s24 = sadd.s32 1, %s818_s22  ;;  %p697_p0 = scmp.ge.s32.totalorder %s822_s23, 1  ;;  %s822_s23 = sphi %s869_s23, %s17_s23   ;;  %s818_s22 = sphi %s867_s22, %s957_s22   ;;  %s814_s21 = sphi %s865_s21, %s956_s21  }
   0x3   : > { %p31_p1 = scmp.ge.s32.totalorder %s29_s24, 2  ;;  %p237_p2 = scmp.lt.s32.totalorder %s822_s23, 3 }
   0x5   : > { %s959_s24 = smov (%p31_p1, %s29_s24), 0  ;;  %p238_p3 = pnand %p697_p0, %p237_p2 }
   0x6   : > { %p282_p4 = scmp.lt.s32.totalorder (!%p238_p3), %s814_s21, 1  ;;  %v824_v0 = vmov (!%p238_p3), 0   ;;  %s825_s29 = smov (!%p238_p3), 127   ;;  %v790_v7 = vld [vmem:[%s950_s1 + $0x4] ss:$8 sps:$4 sm:$0xff] (!%p238_p3)   ;;  %vm426_vm0 = vcmask (!%p238_p3), 130048  }
   0x7   : > { %241 = sbr.rel (%p238_p3) target bundleno = 631 (0x277), region = 40  ;;  %430 = vmatprep.subr.bf16.mxu0 (!%p238_p3), %v824_v0  ;;  %777 = vset.pattern.permute.xlu1 (!%p238_p3), %v824_v0  ;;  %s826_s30 = smov (!%p238_p3), 123   ;;  %v406_v8 = vld [vmem:[%s951_s2 + $0x8] sm:$0xff] (!%p238_p3)  ;;  %v405_v9 = vld [vmem:[%s951_s2] sm:$0xff] (!%p238_p3)  ;;  %vm324_vm1 = vcmask (!%p238_p3), 1039360   ;;  %vm332_vm2 = vcmask (!%p238_p3), 1006592  }
   0x8   : > { %776 = vset.pattern.permute.xlu0 (!%p238_p3), %v824_v0  ;;  %s827_s7 = smov (!%p238_p3), 122   ;;  %719 = vmatprep.mubr.msk.bf16.mxu0 (!%p238_p3), %vm426_vm0, %v790_v7  ;;  %v498_v10 = vld [vmem:[%s953_s4 + $0x8] sm:$0xff] (!%p238_p3)  ;;  %v497_v11 = vld [vmem:[%s953_s4] sm:$0xff] (!%p238_p3)  ;;  %vm340_vm3 = vcmask (!%p238_p3), 998400   ;;  %v828_v29 = vmov (!%p238_p3), 0.0   ;;  %vm829_vm4 = vmmov (!%p238_p3), 0  }
   0x9   : > { %v788_v28 = vld [vmem:[%s950_s1] ss:$8 sps:$4 sm:$0xff] (!%p238_p3)   ;;  %740 = vmatprep.subr.bf16.mxu1 (!%p238_p3), %v828_v29  ;;  %742 = vmatprep.mubr.msk.bf16.mxu1 (!%p238_p3), %vm829_vm4, %v828_v29 }
   0xa   : > { %v791_v49 = vld [vmem:[%s952_s3] sm:$0xff] (!%p238_p3)  }
   0xe   : > { %s961_s21 = smov (!%p282_p4, %s814_s21), 1 }
   0xf   : > { %s728_s25 = sshll.u32 %s961_s21, 6  ;;  %s729_s20 = sshll.u32 %s961_s21, 3 }
  0x10   : > { %s892_s28 = scalar_lea.vmem %s949_s0, %s728_s25  ;;  %s298_s27 = scalar_lea.vmem %s954_s5, %s729_s20 }
  0x11   : > { %v778_v1 = vld [vmem:[%s892_s28] ss:$8 sps:$4 sm:$0xff]   ;;  %v780_v2 = vld [vmem:[%s892_s28 + $0x4] ss:$8 sps:$4 sm:$0xff]   ;;  %v786_v5 = vld [vmem:[%s892_s28 + $0x10] ss:$8 sps:$4 sm:$0xff]  }
  0x12   : > { %320 = vrot.lane.b32.xlu0 %v778_v1, %s825_s29  ;;  %v781_v3 = vld [vmem:[%s892_s28 + $0x20] ss:$8 sps:$4 sm:$0xff]   ;;  %431 = vmatpush1.bf16.msra.mxu0 %v778_v1  ;;  %v783_v4 = vld [vmem:[%s892_s28 + $0x24] ss:$8 sps:$4 sm:$0xff]   ;;  %v784_v6 = vld [vmem:[%s892_s28 + $0x14] ss:$8 sps:$4 sm:$0xff]  }
  0x13   : > { %432 = vmatprep.subr.bf16.mxu0 %v824_v0  ;;  %377 = vrot.lane.b32.xlu1 %v781_v3, %s825_s29  ;;  %v787_v17 = vld [vmem:[%s892_s28 + $0x30] ss:$8 sps:$4 sm:$0xff]  }
  0x16   : > { %322 = vrot.lane.b32.xlu0 %v780_v2, %s825_s29  ;;  %433 = vmatpush1.bf16.msra.mxu0 %v786_v5 }
  0x17   : > { %434 = vmatprep.subr.bf16.mxu0 %v824_v0  ;;  %379 = vrot.lane.b32.xlu1 %v783_v4, %s825_s29 }
  0x1a   : > { %328 = vrot.lane.b32.xlu0 %v778_v1, %s826_s30 }
  0x1b   : > { %330 = vrot.lane.b32.xlu1 %v780_v2, %s826_s30 }
  0x1e   : > { %357 = vrot.lane.b32.xlu0 %v786_v5, %s826_s30 }
  0x1f   : > { %359 = vrot.lane.b32.xlu1 %v784_v6, %s826_s30  ;;  %s730_s30 = sshll.u32 %s961_s21, 4 }
  0x20   : > { %s306_s9 = scalar_lea.vmem %s955_s6, %s730_s30 }
  0x22   : > { %336 = vrot.lane.b32.xlu0 %v778_v1, %s827_s7 }
  0x23   : > { %338 = vrot.lane.b32.xlu1 %v780_v2, %s827_s7 }
  0x26   : > { %409 = vperm.xlu0 %776, %v405_v9  }
  0x27   : > { %414 = vperm.xlu1 %777, %v406_v8  }
  0x2a   : > { %506 = vperm.xlu0 %776, %v498_v10  }
  0x2b   : > { %501 = vperm.xlu1 %777, %v497_v11  }
  0x84   : > { %v321_v12 = vpop.permute.xlu0 %320 }
  0x85   : > { %v378_v13 = vpop.permute.xlu1 %377 }
  0x88   : > { %v323_v14 = vpop.permute.xlu0 %322 }
  0x89   : > { %v325_v15 = vsel %vm324_vm1, %v321_v12, %v323_v14  ;;  %v380_v16 = vpop.permute.xlu1 %379 }
  0x8a   : > { %435 = vmatpush1.bf16.msra.mxu0 %v325_v15  ;;  %v381_v20 = vsel %vm324_vm1, %v378_v13, %v380_v16 }
  0x8b   : > { %436 = vmatprep.subr.bf16.mxu0 %v824_v0 }
  0x8c   : > { %v329_v19 = vpop.permute.xlu0 %328 }
  0x8d   : > { %v331_v18 = vpop.permute.xlu1 %330 }
  0x8e   : > { %437 = vmatpush1.bf16.msra.mxu0 %v781_v3  ;;  %v333_v23 = vsel %vm332_vm2, %v329_v19, %v331_v18 }
  0x8f   : > { %438 = vmatprep.subr.bf16.mxu0 %v824_v0 }
  0x90   : > { %v358_v22 = vpop.permute.xlu0 %357 }
  0x91   : > { %v360_v21 = vpop.permute.xlu1 %359 }
  0x92   : > { %439 = vmatpush1.bf16.msra.mxu0 %v787_v17  ;;  %v361_v24 = vsel %vm332_vm2, %v358_v22, %v360_v21 }
  0x93   : > { %440 = vmatprep.subr.bf16.mxu0 %v824_v0 }
  0x94   : > { %v337_v26 = vpop.permute.xlu0 %336 }
  0x95   : > { %v339_v25 = vpop.permute.xlu1 %338 }
  0x96   : > { %441 = vmatpush1.bf16.msra.mxu0 %v381_v20  ;;  %v341_v27 = vsel %vm340_vm3, %v337_v26, %v339_v25 }
  0x97   : > { %442 = vmatprep.subr.bf16.mxu0 %v824_v0 }
  0x9a   : > { %443 = vmatpush1.bf16.msra.mxu0 %v333_v23 }
  0x9b   : > { %444 = vmatprep.subr.bf16.mxu0 %v824_v0 }
  0x9e   : > { %445 = vmatpush1.bf16.msra.mxu0 %v361_v24 }
  0x9f   : > { %446 = vmatprep.subr.bf16.mxu0 %v824_v0 }
  0xa2   : > { %447 = vmatpush1.bf16.msra.mxu0 %v341_v27 }
  0xa5   : > { %463 = vmatmul.mubr.bf16.vlgmr.msra.gmra.mrb[0].mxu0 %v788_v28  ;;  %v410_v30 = vpop.permute.xlu0 %409 }
  0xa6   : > { %v415_v34 = vpop.permute.xlu1 %414 }
  0xa9   : > { %v507_v54 = vpop.permute.xlu0 %506 }
  0xaa   : > { %v502_v50 = vpop.permute.xlu1 %501 }
 0x178   : > { %v464_v31 = vpop.f32.mrb[0].mxu0 }
 0x179   : > { %v465_v32 = vadd.f32 %v464_v31, %v410_v30  ;;  %v466_v33 = vpop.f32.mrb[1].mxu0 }
 0x17a   : > { %v467_v35 = vpop.f32.mrb[2].mxu0 }
 0x17b   : > { %v720_v36 = vmul.f32 -1.442695, %v465_v32  ;;  %v468_v37 = vadd.f32 %v467_v35, %v415_v34  ;;  %v469_v38 = vpop.f32.mrb[3].mxu0 }
 0x17d   : > { %792 = vpow2.f32 %v720_v36  ;;  %v721_v39 = vmul.f32 -1.442695, %v468_v37 }
 0x17f   : > { %794 = vpow2.f32 %v721_v39 }
 0x187   : > { %v793_v40 = vpop.eup %792 }
 0x188   : > { %v477_v41 = vadd.f32 1.0, %v793_v40 }
 0x189   : > { %v795_v42 = vpop.eup %794 }
 0x18a   : > { %796 = vrcp.f32 %v477_v41  ;;  %v478_v43 = vadd.f32 1.0, %v795_v42 }
 0x18c   : > { %798 = vrcp.f32 %v478_v43 }
 0x194   : > { %v797_v44 = vpop.eup %796 }
 0x195   : > { %v483_v46 = vmul.f32 %v797_v44, %v465_v32 }
 0x196   : > { %v799_v45 = vpop.eup %798 }
 0x197   : > { %v484_v47 = vmul.f32 %v799_v45, %v468_v37 }
 0x199   : > { %v485_v48 = vpack.c.bf16 %v484_v47, %v483_v46 }
 0x19b   : > { %737 = vst [vmem:[%s298_s27] sm:$0xff] %v485_v48   ;;  %741 = vmatpush3.bf16.msra.mxu1 %v485_v48 }
 0x19e   : > { %743 = vmatmul.mubr.msk.bf16.vlgmr.msra.gmra.mrb[0].mxu1 %vm426_vm0, %v791_v49 }
 0x271   : > { %v551_v51 = vpop.f32.mrb[0].mxu1 }
 0x272   : > { %v552_v52 = vadd.f32 %v551_v51, %v502_v50  ;;  %v744_v53 = vpop.f32.mrb[1].mxu1 }
 0x273   : > { %v554_v55 = vpop.f32.mrb[2].mxu1 }
 0x274   : > { %558 = vst [vmem:[%s306_s9] sm:$0xff] %v552_v52  ;;  %v555_v56 = vadd.f32 %v554_v55, %v507_v54  ;;  %v745_v57 = vpop.f32.mrb[3].mxu1 }
 0x276   : > { %559 = vst [vmem:[%s306_s9 + $0x8] sm:$0xff] %v555_v56 }
 0x277 PF: > { %s17_s23 = sadd.s32 1, %s822_s23   ;;  %s956_s21 = smov %s818_s22 }
 0x278   : > { %p14_p5 = scmp.ge.s32.totalorder %s17_s23, 4   ;;  %s957_s22 = smov %s959_s24 }
 0x27a   :  { %16 = sbr.rel (!%p14_p5) target bundleno = 2 (0x2), region = 85 }

// kernel: cond_feature_encoder_forward.5
= control target key start
LH: loop header
LB: loop body
LE: loop exit
PB: predicated region body
PF: predicated region fallthrough
CT: control target
= control target key end

     0   :  { %12 = vsyncpa [#allocation4], 0  ;;  %s1269_s0 = inlined_call_operand.vmem [shape: bf16[2,1,4,16,256], index: 0, kind: input, shape index: {}]   ;;  %s1270_s1 = inlined_call_operand.vmem [shape: bf16[32,144], index: 1, kind: input, shape index: {}]   ;;  %s1271_s2 = inlined_call_operand.vmem [shape: f32[32,1], index: 2, kind: input, shape index: {}]   ;;  %s1272_s3 = inlined_call_operand.vmem [shape: bf16[32,32], index: 3, kind: input, shape index: {}]   ;;  %s1273_s4 = inlined_call_operand.vmem [shape: f32[32,1], index: 4, kind: input, shape index: {}]   ;;  %s1274_s5 = inlined_call_operand.hbm [shape: bf16[2,32,128], index: 5, kind: output, shape index: {0}]   ;;  %s1275_s6 = inlined_call_operand.vmem [shape: f32[2,32,128], index: 6, kind: output, shape index: {1}]  }
   0x1   :  { %14 = vsyncpa [#allocation4 + $0x1], 0  ;;  %s1081_s21 = smov 0   ;;  %s1083_s22 = smov 0  }
   0x2   :  { %s1085_s23 = smov 0   ;;  %s1087_s24 = smov 0  }
   0x3   :  { %s1089_s25 = smov 0   ;;  %s1091_s26 = smov 0  }
   0x4 LB: > { %s786_s27 = sadd.s32 4294967295, %s1037_s26   ;;  %s787_s28 = sadd.s32 4294967294, %s1037_s26   ;;  %s1037_s26 = sphi %s1091_s26, %s20_s26   ;;  %s1033_s25 = sphi %s1089_s25, %s1282_s25   ;;  %s1029_s24 = sphi %s1087_s24, %s1281_s24   ;;  %s1025_s23 = sphi %s1085_s23, %s1280_s23   ;;  %s1021_s22 = sphi %s1083_s22, %s1279_s22   ;;  %s1017_s21 = sphi %s1081_s21, %s1278_s21  }
   0x5   : > { %s32_s29 = sadd.s32 1, %s1033_s25  ;;  %s153_s30 = sadd.s32 1, %s1025_s23 }
   0x6   : > { %p34_p0 = scmp.ge.s32.totalorder %s32_s29, 2  ;;  %p163_p1 = scmp.ne.s32.totalorder %s1025_s23, %s1021_s22 }
   0x7   : > { %p164_p2 = scmp.eq.s32.totalorder %s786_s27, 1  ;;  %p169_p3 = scmp.ne.s32.totalorder %s1021_s22, %s1017_s21 }
   0x8   : > { %s1284_s29 = smov (%p34_p0, %s32_s29), 0  ;;  %p170_p5 = scmp.eq.s32.totalorder %s787_s28, 1 }
   0x9   : > { %p1121_p4 = por %p164_p2, %p163_p1  ;;  %s148_s8 = ssub.s32 %s1033_s25, %s1284_s29 }
   0xa   : > { %p790_p6 = scmp.ge.s32.totalorder %s1037_s26, 1  ;;  %p151_p7 = scmp.eq.s32.totalorder %s148_s8, 0 }
   0xb   : > { %p1128_p8 = por %p170_p5, %p169_p3  ;;  %p240_p9 = scmp.lt.s32.totalorder %s1037_s26, 3 }
   0xc   : > { %s1134_s10 = scalar_select %p151_p7, %s1025_s23, %s153_s30  }
   0xd   : > { %p241_p10 = pnand %p790_p6, %p240_p9 }
   0xe   : > { %p282_p11 = scmp.lt.s32.totalorder (!%p241_p10), %s1029_s24, 1  ;;  %v1039_v0 = vmov (!%p241_p10), 0   ;;  %s1040_s16 = smov (!%p241_p10), 127   ;;  %v937_v7 = vld [vmem:[%s1270_s1 + $0x4] ss:$8 sps:$4 sm:$0xff] (!%p241_p10)   ;;  %vm441_vm0 = vcmask (!%p241_p10), 130048  }
   0xf   : > { %244 = sbr.rel (%p241_p10) target bundleno = 650 (0x28a), region = 40  ;;  %448 = vmatprep.subr.bf16.mxu0 (!%p241_p10), %v1039_v0  ;;  %924 = vset.pattern.permute.xlu1 (!%p241_p10), %v1039_v0  ;;  %s1041_s17 = smov (!%p241_p10), 125   ;;  %v400_v8 = vld [vmem:[%s1271_s2 + $0x8] sm:$0xff] (!%p241_p10)  ;;  %v399_v9 = vld [vmem:[%s1271_s2] sm:$0xff] (!%p241_p10)  ;;  %v401_v10 = vld [vmem:[%s1271_s2 + $0x10] sm:$0xff] (!%p241_p10)  ;;  %vm316_vm1 = vcmask (!%p241_p10), 1039360  }
  0x10   : > { %923 = vset.pattern.permute.xlu0 (!%p241_p10), %v1039_v0  ;;  %s1042_s18 = smov (!%p241_p10), 124   ;;  %813 = vmatprep.mubr.msk.bf16.mxu0 (!%p241_p10), %vm441_vm0, %v937_v7  ;;  %v402_v11 = vld [vmem:[%s1271_s2 + $0x18] sm:$0xff] (!%p241_p10)  ;;  %v549_v12 = vld [vmem:[%s1273_s4] sm:$0xff] (!%p241_p10)  ;;  %v550_v13 = vld [vmem:[%s1273_s4 + $0x8] sm:$0xff] (!%p241_p10)  ;;  %vm324_vm2 = vcmask (!%p241_p10), 1022976   ;;  %vm332_vm3 = vcmask (!%p241_p10), 1014784  }
  0x11   : > { %v551_v14 = vld [vmem:[%s1273_s4 + $0x10] sm:$0xff] (!%p241_p10)  ;;  %v552_v15 = vld [vmem:[%s1273_s4 + $0x18] sm:$0xff] (!%p241_p10)  ;;  %v935_v32 = vld [vmem:[%s1270_s1] ss:$8 sps:$4 sm:$0xff] (!%p241_p10)   ;;  %vm583_vm4 = vcmask (!%p241_p10), 261120   ;;  %s269_s20 = sand.u32 (!%p241_p10), 1, %s1021_s22  }
  0x12   : > { %v938_v33 = vld [vmem:[%s1270_s1 + $0x14] ss:$8 sps:$4 sm:$0xff] (!%p241_p10)   ;;  %v940_v34 = vld [vmem:[%s1270_s1 + $0x10] ss:$8 sps:$4 sm:$0xff] (!%p241_p10)   ;;  %v941_v35 = vld [vmem:[%s1272_s3] sm:$0xff] (!%p241_p10)   ;;  %s791_s27 = sshll.u32 (!%p241_p10), %s269_s20, 4 }
  0x13   : > { %858 = vmatprep.mubr.msk.bf16.mxu1 (!%p241_p10), %vm583_vm4, %v941_v35  ;;  %s271_s28 = scalar_lea.vmem (!%p241_p10), [#allocation3], %s791_s27  ;;  %s1043_s19 = smov (!%p241_p10), [#allocation3]  }
  0x16   : > { %s1140_s11 = scalar_select %p282_p11, %s1029_s24, 1 }
  0x18   : > { %s832_s12 = sshll.u32 %s1140_s11, 6 }
  0x19   : > { %s1147_s15 = scalar_lea.vmem %s1269_s0, %s832_s12  ;;  %s666_s12 = sshll.u32 %s271_s28, 4  ;;  %s1217_s12 = int_to_ptr.vmem [resolvable:$true] %s666_s12 }
  0x1a   : > { %v925_v1 = vld [vmem:[%s1147_s15] ss:$8 sps:$4 sm:$0xff]   ;;  %v927_v2 = vld [vmem:[%s1147_s15 + $0x4] ss:$8 sps:$4 sm:$0xff]   ;;  %v933_v5 = vld [vmem:[%s1147_s15 + $0x10] ss:$8 sps:$4 sm:$0xff]  }
  0x1b   : > { %312 = vrot.lane.b32.xlu0 %v925_v1, %s1040_s16  ;;  %v928_v3 = vld [vmem:[%s1147_s15 + $0x20] ss:$8 sps:$4 sm:$0xff]   ;;  %449 = vmatpush1.bf16.msra.mxu0 %v925_v1  ;;  %v930_v4 = vld [vmem:[%s1147_s15 + $0x24] ss:$8 sps:$4 sm:$0xff]   ;;  %v931_v6 = vld [vmem:[%s1147_s15 + $0x14] ss:$8 sps:$4 sm:$0xff]  }
  0x1c   : > { %450 = vmatprep.subr.bf16.mxu0 %v1039_v0  ;;  %369 = vrot.lane.b32.xlu1 %v928_v3, %s1040_s16  ;;  %v934_v21 = vld [vmem:[%s1147_s15 + $0x30] ss:$8 sps:$4 sm:$0xff]   ;;  %s838_s15 = sshll.u32 %s1029_s24, 8  ;;  %s963_s24 = sshll.u32 %s1043_s19, 4  ;;  %s964_s24 = int_to_ptr.vmem [resolvable:$false] %s963_s24 }
  0x1d   : > { %s965_s27 = scalar_lea.vmem %s964_s24, 512  ;;  %p966_p1 = scmp.lt.s32.totalorder %s1217_s12, %s964_s24 }
  0x1f   : > { %314 = vrot.lane.b32.xlu0 %v927_v2, %s1040_s16  ;;  %451 = vmatpush1.bf16.msra.mxu0 %v933_v5 }
  0x20   : > { %452 = vmatprep.subr.bf16.mxu0 %v1039_v0  ;;  %371 = vrot.lane.b32.xlu1 %v930_v4, %s1040_s16  ;;  %s1215_s16 = scalar_lea.hbm %s1274_s5, %s838_s15 }
  0x23   : > { %320 = vrot.lane.b32.xlu0 %v925_v1, %s1041_s17 }
  0x24   : > { %322 = vrot.lane.b32.xlu1 %v927_v2, %s1041_s17 }
  0x27   : > { %349 = vrot.lane.b32.xlu0 %v933_v5, %s1041_s17 }
  0x28   : > { %351 = vrot.lane.b32.xlu1 %v931_v6, %s1041_s17  ;;  %s1219_s17 = scalar_lea.sflag [#allocation4], %s269_s20 }
  0x2b   : > { %328 = vrot.lane.b32.xlu0 %v925_v1, %s1042_s18 }
  0x2c   : > { %330 = vrot.lane.b32.xlu1 %v927_v2, %s1042_s18  ;;  %s959_s18 = scalar_lea.vmem %s1217_s12, 256 }
  0x2d   : > { %p960_p12 = scmp.ne.s32.totalorder %s1217_s12, %s959_s18  ;;  %p967_p2 = scmp.lt.s32.totalorder %s965_s27, %s959_s18 }
  0x2f   : > { %405 = vperm.xlu0 %923, %v399_v9   ;;  %p961_p13 = pnand %p960_p12, %p1121_p4  ;;  %p968_p3 = por %p967_p2, %p966_p1 }
  0x30   : > { %410 = vperm.xlu1 %924, %v400_v8  }
  0x31   : > { %p962_p0 = pneg %p961_p13 }
  0x33   : > { %420 = vperm.xlu0 %923, %v402_v11   ;;  %p969_p5 = pnand %p968_p3, %p962_p0 }
  0x34   : > { %415 = vperm.xlu1 %924, %v401_v10   ;;  %v942_v10 = vld [vmem:[%s1272_s3 + $0x8] sm:$0xff]  }
  0x37   : > { %560 = vperm.xlu0 %923, %v550_v13  }
  0x38   : > { %555 = vperm.xlu1 %924, %v549_v12  }
  0x3b   : > { %570 = vperm.xlu0 %923, %v552_v15  }
  0x3c   : > { %565 = vperm.xlu1 %924, %v551_v14  }
  0x8d   : > { %v313_v16 = vpop.permute.xlu0 %312 }
  0x8e   : > { %v370_v17 = vpop.permute.xlu1 %369 }
  0x91   : > { %v315_v18 = vpop.permute.xlu0 %314 }
  0x92   : > { %v317_v19 = vsel %vm316_vm1, %v313_v16, %v315_v18  ;;  %v372_v20 = vpop.permute.xlu1 %371 }
  0x93   : > { %453 = vmatpush1.bf16.msra.mxu0 %v317_v19  ;;  %v373_v24 = vsel %vm316_vm1, %v370_v17, %v372_v20 }
  0x94   : > { %454 = vmatprep.subr.bf16.mxu0 %v1039_v0 }
  0x95   : > { %v321_v23 = vpop.permute.xlu0 %320 }
  0x96   : > { %v323_v22 = vpop.permute.xlu1 %322 }
  0x97   : > { %455 = vmatpush1.bf16.msra.mxu0 %v928_v3  ;;  %v325_v27 = vsel %vm324_vm2, %v321_v23, %v323_v22 }
  0x98   : > { %456 = vmatprep.subr.bf16.mxu0 %v1039_v0 }
  0x99   : > { %v350_v26 = vpop.permute.xlu0 %349 }
  0x9a   : > { %v352_v25 = vpop.permute.xlu1 %351 }
  0x9b   : > { %457 = vmatpush1.bf16.msra.mxu0 %v934_v21  ;;  %v353_v28 = vsel %vm324_vm2, %v350_v26, %v352_v25 }
  0x9c   : > { %458 = vmatprep.subr.bf16.mxu0 %v1039_v0 }
  0x9d   : > { %v329_v30 = vpop.permute.xlu0 %328 }
  0x9e   : > { %v331_v29 = vpop.permute.xlu1 %330 }
  0x9f   : > { %459 = vmatpush1.bf16.msra.mxu0 %v373_v24  ;;  %v333_v31 = vsel %vm332_vm3, %v329_v30, %v331_v29 }
  0xa0   : > { %460 = vmatprep.subr.bf16.mxu0 %v1039_v0 }
  0xa3   : > { %461 = vmatpush1.bf16.msra.mxu0 %v325_v27 }
  0xa4   : > { %462 = vmatprep.subr.bf16.mxu0 %v1039_v0 }
  0xa7   : > { %463 = vmatpush1.bf16.msra.mxu0 %v353_v28 }
  0xa8   : > { %464 = vmatprep.subr.bf16.mxu0 %v1039_v0 }
  0xab   : > { %465 = vmatpush1.bf16.msra.mxu0 %v333_v31 }
  0xae   : > { %481 = vmatmul.mubr.bf16.vlgmr.msra.gmra.mrb[0].mxu0 %v935_v32  ;;  %v406_v36 = vpop.permute.xlu0 %405 }
  0xaf   : > { %814 = vmatprep.mubr.msk.bf16.mxu0 %vm441_vm0, %v938_v33  ;;  %v411_v40 = vpop.permute.xlu1 %410 }
  0xb2   : > { %v421_v50 = vpop.permute.xlu0 %420 }
  0xb3   : > { %v416_v46 = vpop.permute.xlu1 %415 }
  0xb6   : > { %489 = vmatmul.mubr.bf16.gmra.mrb[4].mxu0 %v940_v34 }
 0x181   : > { %v482_v37 = vpop.f32.mrb[0].mxu0 }
 0x182   : > { %v483_v38 = vadd.f32 %v482_v37, %v406_v36  ;;  %v484_v39 = vpop.f32.mrb[1].mxu0 }
 0x183   : > { %v485_v41 = vpop.f32.mrb[2].mxu0 }
 0x184   : > { %v815_v42 = vmul.f32 -1.442695, %v483_v38  ;;  %v486_v43 = vadd.f32 %v485_v41, %v411_v40  ;;  %v487_v44 = vpop.f32.mrb[3].mxu0 }
 0x186   : > { %943 = vpow2.f32 %v815_v42  ;;  %v816_v45 = vmul.f32 -1.442695, %v486_v43 }
 0x188   : > { %945 = vpow2.f32 %v816_v45 }
 0x189   : > { %v490_v47 = vpop.f32.mrb[4].mxu0 }
 0x18a   : > { %v491_v48 = vadd.f32 %v490_v47, %v416_v46  ;;  %v492_v49 = vpop.f32.mrb[5].mxu0 }
 0x18b   : > { %v493_v51 = vpop.f32.mrb[6].mxu0 }
 0x18c   : > { %v817_v52 = vmul.f32 -1.442695, %v491_v48  ;;  %v494_v53 = vadd.f32 %v493_v51, %v421_v50  ;;  %v495_v54 = vpop.f32.mrb[7].mxu0 }
 0x18e   : > { %947 = vpow2.f32 %v817_v52  ;;  %v818_v55 = vmul.f32 -1.442695, %v494_v53 }
 0x190   : > { %v944_v56 = vpop.eup %943  ;;  %949 = vpow2.f32 %v818_v55 }
 0x191   : > { %v509_v57 = vadd.f32 1.0, %v944_v56 }
 0x192   : > { %v946_v58 = vpop.eup %945 }
 0x193   : > { %951 = vrcp.f32 %v509_v57  ;;  %v510_v59 = vadd.f32 1.0, %v946_v58 }
 0x195   : > { %953 = vrcp.f32 %v510_v59 }
 0x198   : > { %v948_v60 = vpop.eup %947 }
 0x199   : > { %v511_v61 = vadd.f32 1.0, %v948_v60 }
 0x19a   : > { %v950_v62 = vpop.eup %949 }
 0x19b   : > { %955 = vrcp.f32 %v511_v61  ;;  %v512_v63 = vadd.f32 1.0, %v950_v62 }
 0x19d   : > { %v952_v0 = vpop.eup %951  ;;  %957 = vrcp.f32 %v512_v63 }
 0x19e   : > { %v521_v2 = vmul.f32 %v952_v0, %v483_v38 }
 0x19f   : > { %v954_v1 = vpop.eup %953 }
 0x1a0   : > { %v522_v3 = vmul.f32 %v954_v1, %v486_v43 }
 0x1a2   : > { %v525_v4 = vpack.c.bf16 %v522_v3, %v521_v2 }
 0x1a4   : > { %843 = vst [vmem:[%s271_s28] sm:$0xff] %v525_v4   ;;  %854 = vmatprep.subr.bf16.mxu1 %v525_v4 }
 0x1a5   : > { %v956_v5 = vpop.eup %955  ;;  %855 = vmatpush3.bf16.msra.mxu1 %v525_v4 }
 0x1a6   : > { %v523_v7 = vmul.f32 %v956_v5, %v491_v48 }
 0x1a7   : > { %v958_v6 = vpop.eup %957 }
 0x1a8   : > { %v524_v8 = vmul.f32 %v958_v6, %v494_v53 }
 0x1aa   : > { %v526_v9 = vpack.c.bf16 %v524_v8, %v523_v7 }
 0x1ac   : > { %849 = vst [vmem:[%s271_s28 + $0x8] sm:$0xff] %v526_v9   ;;  %856 = vmatprep.subr.bf16.mxu1 %v526_v9 }
 0x1ad   : > { %857 = vmatpush3.bf16.msra.mxu1 %v526_v9 }
 0x1b0   : > { %859 = vmatmul.mubr.msk.bf16.vlgmr.msra.gmra.mrb[0].mxu1 %vm583_vm4, %v942_v10 }
 0x1b1   : > { %972 = shalt.err (!%p969_p5)
}
 0x1b2   : > { %s973_s20 = scalar_lea.hbm %s1215_s16, 256  ;;  %s977_s8 = scalar_lea.hbm %s1274_s5, 512 }
 0x1b3   : > { %p974_p6 = scmp.ne.s32.totalorder %s1215_s16, %s973_s20  ;;  %p978_p10 = scmp.lt.u32.totalorder %s1215_s16, %s1274_s5 }
 0x1b4   : > { %p979_p11 = scmp.lt.u32.totalorder %s977_s8, %s973_s20  ;;  %p981_p13 = scmp.lt.u32.totalorder %s973_s20, %s1215_s16 }
 0x1b5   : > { %p975_p7 = pnand %p974_p6, %p1121_p4 }
 0x1b6   : > { %p980_p12 = por %p979_p11, %p978_p10 }
 0x1b7   : > { %p976_p9 = pneg %p975_p7 }
 0x1b8   : > { %p982_p0 = por %p981_p13, %p980_p12 }
 0x1ba   : > { %p983_p1 = pnand %p982_p0, %p976_p9 }
 0x1bc   : > { %986 = shalt.err (!%p983_p1)
}
 0x1bd   : > { %s1044_s14 = smov 64   ;;  %s1045_s18 = smov 4   ;;  %v556_v11 = vpop.permute.xlu1 %555  ;;  %v561_v12 = vpop.permute.xlu0 %560 }
 0x1be   : > { %862 = dma.vmem_to_hbm [thread:$0]  (%p1121_p4), %s1217_s12, 256, %s1215_s16, %s1219_s17, %s1044_s14, %s1044_s14, %s1045_s18  }
 0x1bf   : > { %s833_s19 = sshll.u32 %s1140_s11, 5 }
 0x1c0   : > { %s298_s20 = scalar_lea.vmem %s1275_s6, %s833_s19 }
 0x1c1   : > { %v566_v13 = vpop.permute.xlu1 %565  ;;  %v571_v17 = vpop.permute.xlu0 %570 }
 0x283   : > { %v860_v14 = vpop.f32.mrb[0].mxu1 }
 0x284   : > { %v633_v15 = vadd.f32 %v860_v14, %v566_v13  ;;  %v624_v16 = vpop.f32.mrb[1].mxu1 }
 0x285   : > { %v625_v18 = vadd.f32 %v624_v16, %v556_v11  ;;  %v861_v19 = vpop.f32.mrb[2].mxu1 }
 0x286   : > { %641 = vst [vmem:[%s298_s20 + $0x10] sm:$0xff] %v633_v15  ;;  %v636_v20 = vadd.f32 %v861_v19, %v571_v17  ;;  %v627_v21 = vpop.f32.mrb[3].mxu1 }
 0x287   : > { %639 = vst [vmem:[%s298_s20] sm:$0xff] %v625_v18  ;;  %v628_v22 = vadd.f32 %v627_v21, %v561_v12 }
 0x288   : > { %642 = vst [vmem:[%s298_s20 + $0x18] sm:$0xff] %v636_v20 }
 0x289   : > { %640 = vst [vmem:[%s298_s20 + $0x8] sm:$0xff] %v628_v22 }
 0x28a PF: > { %p868_p4 = scmp.ge.s32.totalorder %s1037_s26, 2  ;;  %s684_s7 = sand.u32 1, %s1017_s21  }
 0x28b   : > { %s685_s11 = scalar_lea.sflag [#allocation4], %s684_s7 }
 0x28c   : > { %p865_p2 = pnand %p868_p4, %p1128_p8 }
 0x28e   : > { %1012 = dma.done.wait (!%p865_p2), %s685_s11, 256  }
 0x28f   : > { %1014 = vsyncadd (!%p865_p2), %s685_s11, 4294967040  ;;  %s20_s26 = sadd.s32 1, %s1037_s26   ;;  %s1278_s21 = smov %s1021_s22 }
 0x290   : > { %p17_p3 = scmp.ge.s32.totalorder %s20_s26, 4   ;;  %s1279_s22 = smov %s1025_s23 }
 0x291   : > { %s1280_s23 = smov %s1134_s10  ;;  %s1281_s24 = smov %s1033_s25 }
 0x292   : > { %s1282_s25 = smov %s1284_s29  ;;  %19 = sbr.rel (!%p17_p3) target bundleno = 4 (0x4), region = 90 }
 0x299   :  { %701 = vsyncpa [#allocation4], 1 }
 0x29a   :  { %703 = vsyncpa [#allocation4 + $0x1], 1 }

</bundles_post_ra>
